<compile_context>
chip_gen: v7x
topology: tpu7x:2x2x1
jax: 0.10.0
libtpu: 0.0.40
codegen_flags: <defaults>
</compile_context>

<pallas_src>
import functools

import jax
import jax.numpy as jnp
from jax import lax
from jax.experimental import pallas as pl
from jax.experimental.pallas import tpu as pltpu

_LANES = 128
_VMEM_LIMIT = 32 * 1024 * 1024
_BN_EPS = 1e-5


def _round_up(x, m):
    return ((x + m - 1) // m) * m


def _pick_tile(m, candidates=(512, 256, 128, 64, 32, 16, 8)):
    """Largest tile from `candidates` that divides m exactly (else the full dim)."""
    for t in candidates:
        if m % t == 0:
            return t
    return m


# ----------------------------- Pallas kernels ------------------------------ #

def _conv_matmul_kernel(p_ref, w_ref, b_ref, o_ref, sum_ref, ssq_ref, acc_ref):
    """y = patches @ W + b (bf16 MXU, f32 acc) fused with per-tile BN statistics.

    grid = (M/tm, Cout/tn, K/tk); K is the reduction ('arbitrary', last) axis.
    """
    k = pl.program_id(2)

    @pl.when(k == 0)
    def _():
        acc_ref[...] = jnp.zeros_like(acc_ref)

    acc_ref[...] += jnp.dot(p_ref[...], w_ref[...],
                            preferred_element_type=jnp.float32)

    @pl.when(k == pl.num_programs(2) - 1)
    def _():
        y = acc_ref[...] + b_ref[...]
        o_ref[...] = y
        # Per-tile partial BN stats, replicated across 8 sublanes so the store is a
        # clean (8, tn) tile.  The wrapper sums rows [::8] over the M tiles.
        s = jnp.sum(y, axis=0, keepdims=True)
        q = jnp.sum(y * y, axis=0, keepdims=True)
        sum_ref[...] = jnp.broadcast_to(s, sum_ref.shape)
        ssq_ref[...] = jnp.broadcast_to(q, ssq_ref.shape)


def _scale_shift_kernel(x_ref, sc_ref, sh_ref, o_ref, *, relu):
    y = x_ref[...] * sc_ref[...] + sh_ref[...]
    if relu:
        y = jnp.maximum(y, 0.0)
    o_ref[...] = y


def _scale_shift_add_kernel(x_ref, sc_ref, sh_ref, r_ref, o_ref, *, relu):
    y = x_ref[...] * sc_ref[...] + sh_ref[...] + r_ref[...]
    if relu:
        y = jnp.maximum(y, 0.0)
    o_ref[...] = y


# ------------------------------ JAX wrappers ------------------------------- #

def _conv_matmul(patches, wmat, bias):
    """(M, K) bf16 @ (K, Cp) bf16 + bias -> f32 (M, Cp), plus per-tile BN stats."""
    m, k_dim = patches.shape
    cp = wmat.shape[1]

    tm = _pick_tile(m)
    tn = min(128, cp)                     # cp is a multiple of 128 -> lane-dense
    tk = k_dim
    if k_dim > 2304:                      # keep full K while it is small
        for cand in (2304, 1152, 1024, 768, 512, 384, 256, 128):
            if k_dim % cand == 0:
                tk = cand
                break

    grid = (m // tm, cp // tn, k_dim // tk)
    n_mt = grid[0]

    out_shape = (
        jax.ShapeDtypeStruct((m, cp), jnp.float32),
        jax.ShapeDtypeStruct((n_mt * 8, cp), jnp.float32),   # per-tile sums
        jax.ShapeDtypeStruct((n_mt * 8, cp), jnp.float32),   # per-tile sum of squares
    )
    grid_spec = pltpu.PrefetchScalarGridSpec(
        num_scalar_prefetch=0,
        grid=grid,
        in_specs=[
            pl.BlockSpec((tm, tk), lambda i, j, k: (i, k)),   # patches
            pl.BlockSpec((tk, tn), lambda i, j, k: (k, j)),   # weights
            pl.BlockSpec((1, tn), lambda i, j, k: (0, j)),    # bias (same tile each step)
        ],
        out_specs=(
            pl.BlockSpec((tm, tn), lambda i, j, k: (i, j)),
            pl.BlockSpec((8, tn), lambda i, j, k: (i, j)),
            pl.BlockSpec((8, tn), lambda i, j, k: (i, j)),
        ),
        scratch_shapes=[pltpu.VMEM((tm, tn), jnp.float32)],
    )
    y, sums, ssqs = pl.pallas_call(
        _conv_matmul_kernel,
        out_shape=out_shape,
        grid_spec=grid_spec,
        compiler_params=pltpu.CompilerParams(
            dimension_semantics=("parallel", "parallel", "arbitrary"),
            vmem_limit_bytes=_VMEM_LIMIT),
        cost_estimate=pl.CostEstimate(
            flops=2 * m * k_dim * cp,
            transcendentals=0,
            bytes_accessed=m * k_dim * 2 + k_dim * cp * 2 + m * cp * 4),
    )(patches, wmat, bias)
    return y, sums, ssqs


def _bn_scale_shift(sums, ssqs, m, gamma, beta):
    """Training-mode BN coefficients from per-tile sums (biased variance over M)."""
    s = jnp.sum(sums[::8], axis=0)
    q = jnp.sum(ssqs[::8], axis=0)
    mean = s / m
    var = jnp.maximum(q / m - mean * mean, 0.0)
    scale = gamma * lax.rsqrt(var + _BN_EPS)
    shift = beta - mean * scale
    return scale.reshape(1, -1), shift.reshape(1, -1)


def _bn_apply(y, scale, shift, residual=None, relu=True):
    """Lane-dense tiled y*scale + shift (+ residual) (+ ReLU)."""
    m, c = y.shape
    tm = _pick_tile(m, (1024, 512, 256, 128, 64, 32, 16, 8))
    tn = min(128, c)
    grid = (m // tm, c // tn)

    x_spec = pl.BlockSpec((tm, tn), lambda i, j: (i, j))
    v_spec = pl.BlockSpec((1, tn), lambda i, j: (0, j))
    if residual is None:
        kernel = functools.partial(_scale_shift_kernel, relu=relu)
        in_specs = [x_spec, v_spec, v_spec]
        args = (y, scale, shift)
    else:
        kernel = functools.partial(_scale_shift_add_kernel, relu=relu)
        in_specs = [x_spec, v_spec, v_spec, x_spec]
        args = (y, scale, shift, residual)

    return pl.pallas_call(
        kernel,
        out_shape=jax.ShapeDtypeStruct((m, c), jnp.float32),
        grid_spec=pltpu.PrefetchScalarGridSpec(
            num_scalar_prefetch=0,
            grid=grid,
            in_specs=in_specs,
            out_specs=pl.BlockSpec((tm, tn), lambda i, j: (i, j))),
        compiler_params=pltpu.CompilerParams(
            dimension_semantics=("parallel", "parallel"),
            vmem_limit_bytes=_VMEM_LIMIT),
    )(*args)


def _conv3x3(x, wmat, bias, stride):
    """3x3 conv, padding=1, given stride, on channel-padded NHWC input."""
    n, h, w, cp = x.shape
    ho = (h + 2 - 3) // stride + 1
    wo = (w + 2 - 3) // stride + 1
    xp = jnp.pad(x, ((0, 0), (1, 1), (1, 1), (0, 0))).astype(jnp.bfloat16)
    # TODO(synk): fold the 9 (kh,kw) taps into the matmul's reduction grid axis
    # (element-offset blocks / manual DMA on the padded NHWC tensor) so this
    # 9x-duplicated im2col slab is never materialized in HBM; here it is built in bf16
    # and only streamed tile-by-tile through VMEM by the BlockSpec.
    cols = []
    for kh in range(3):
        for kw in range(3):
            cols.append(xp[:, kh:kh + stride * (ho - 1) + 1:stride,
                           kw:kw + stride * (wo - 1) + 1:stride, :])
    patches = jnp.stack(cols, axis=3).reshape(n * ho * wo, 9 * cp)
    y, sums, ssqs = _conv_matmul(patches, wmat, bias)
    return y, sums, ssqs, (n, ho, wo)


def _conv1x1_s2(x, wmat, bias):
    """1x1 conv, stride 2, no padding (ResBlock downsample shortcut)."""
    xs = x[:, ::2, ::2, :]
    n, ho, wo, cp = xs.shape
    flat = xs.reshape(n * ho * wo, cp).astype(jnp.bfloat16)
    y, _, _ = _conv_matmul(flat, wmat, bias)
    return y


def _res_block(x, pp, stride):
    """One ResBlock on a channel-padded NHWC slab."""
    n0, h, w, cp_in = x.shape

    y1, s1, q1, (n, ho, wo) = _conv3x3(x, pp["w1"], pp["b1"], stride)
    m = n * ho * wo
    sc1, sh1 = _bn_scale_shift(s1, q1, m, pp["g1"], pp["bt1"])
    a1 = _bn_apply(y1, sc1, sh1, residual=None, relu=True)        # bn1 + relu
    a1 = a1.reshape(n, ho, wo, -1)

    y2, s2, q2, _ = _conv3x3(a1, pp["w2"], pp["b2"], 1)
    sc2, sh2 = _bn_scale_shift(s2, q2, m, pp["g2"], pp["bt2"])

    if wo != w:                       # spatial changed -> 1x1 stride-2 shortcut conv
        res = _conv1x1_s2(x, pp["wd"], pp["bd"])
    else:
        res = x.reshape(n0 * h * w, cp_in)
    out = _bn_apply(y2, sc2, sh2, residual=res, relu=True)        # bn2 + add + relu
    return out.reshape(n, ho, wo, -1)


def _prep_conv3x3(w, b, cin_p, cout_p):
    cout, cin, _, _ = w.shape
    wt = jnp.transpose(w, (2, 3, 1, 0))                           # (3,3,Cin,Cout)
    wt = jnp.pad(wt, ((0, 0), (0, 0), (0, cin_p - cin), (0, cout_p - cout)))
    wmat = wt.reshape(9 * cin_p, cout_p).astype(jnp.bfloat16)
    bias = jnp.pad(b, (0, cout_p - cout)).reshape(1, cout_p).astype(jnp.float32)
    return wmat, bias


def _prep_block_params(p, cin_p, cout_p):
    cout, cin = p["w1"].shape[0], p["w1"].shape[1]

    def pad_vec(v, fill=0.0):
        return jnp.pad(v, (0, cout_p - cout),
                       constant_values=fill).astype(jnp.float32)

    w1, b1 = _prep_conv3x3(p["w1"], p["b1"], cin_p, cout_p)
    w2, b2 = _prep_conv3x3(p["w2"], p["b2"], cout_p, cout_p)
    wd = jnp.transpose(p["wd"][:, :, 0, 0])                       # (Cin, Cout)
    wd = jnp.pad(wd, ((0, cin_p - cin), (0, cout_p - cout))).astype(jnp.bfloat16)
    bd = pad_vec(p["bd"]).reshape(1, cout_p)
    return {
        "w1": w1, "b1": b1, "g1": pad_vec(p["g1"], 1.0), "bt1": pad_vec(p["bt1"]),
        "w2": w2, "b2": b2, "g2": pad_vec(p["g2"], 1.0), "bt2": pad_vec(p["bt2"]),
        "wd": wd, "bd": bd,
    }


def resnet_layer_forward(x_nchw, block_params, stride_init_block=1):
    """Pallas implementation of ResnetLayer.forward.  Input/output are NCHW f32."""
    n, cin, h, w = x_nchw.shape
    cout = block_params[0]["w1"].shape[0]
    cin_p = _round_up(cin, _LANES)
    cout_p = _round_up(cout, _LANES)

    x = jnp.transpose(x_nchw, (0, 2, 3, 1)).astype(jnp.float32)   # NCHW -> NHWC
    x = jnp.pad(x, ((0, 0), (0, 0), (0, 0), (0, cin_p - cin)))    # lane-dense channels

    cur_cin_p = cin_p
    for bi, p in enumerate(block_params):
        stride = stride_init_block if bi == 0 else 1
        pp = _prep_block_params(p, cur_cin_p, cout_p)
        x = _res_block(x, pp, stride)
        cur_cin_p = cout_p

    x = x[..., :cout]
    return jnp.transpose(x, (0, 3, 1, 2))                         # NHWC -> NCHW


# --------------------------- pure-JAX reference ----------------------------- #

def _ref_conv(x, w, b, stride, padding):
    y = lax.conv_general_dilated(
        x, w, window_strides=(stride, stride),
        padding=((padding, padding), (padding, padding)),
        dimension_numbers=("NCHW", "OIHW", "NCHW"))
    return y + b[None, :, None, None]


def _ref_bn(x, g, b, eps=_BN_EPS):
    mean = jnp.mean(x, axis=(0, 2, 3), keepdims=True)
    var = jnp.mean((x - mean) ** 2, axis=(0, 2, 3), keepdims=True)
    return (g[None, :, None, None] * (x - mean) * lax.rsqrt(var + eps)
            + b[None, :, None, None])


def _ref_res_block(x, p, stride):
    xb = x
    y = _ref_conv(x, p["w1"], p["b1"], stride, 1)
    y = jnp.maximum(_ref_bn(y, p["g1"], p["bt1"]), 0.0)
    y = _ref_conv(y, p["w2"], p["b2"], 1, 1)
    y = _ref_bn(y, p["g2"], p["bt2"])
    if xb.shape[-1] != y.shape[-1]:
        xb = _ref_conv(xb, p["wd"], p["bd"], 2, 0)
    return jnp.maximum(y + xb, 0.0)


def _ref_resnet_layer(x, blocks, stride_init_block):
    for i, p in enumerate(blocks):
        x = _ref_res_block(x, p, stride_init_block if i == 0 else 1)
    return x


# ---------------------------------- main ----------------------------------- #

def _init_block_params(key, cin, cout):
    ks = jax.random.split(key, 10)
    nrm = jax.random.normal
    return {
        "w1": 0.1 * nrm(ks[0], (cout, cin, 3, 3), jnp.float32),
        "b1": 0.1 * nrm(ks[1], (cout,), jnp.float32),
        "g1": 1.0 + 0.1 * nrm(ks[2], (cout,), jnp.float32),
        "bt1": 0.1 * nrm(ks[3], (cout,), jnp.float32),
        "w2": 0.1 * nrm(ks[4], (cout, cout, 3, 3), jnp.float32),
        "b2": 0.1 * nrm(ks[5], (cout,), jnp.float32),
        "g2": 1.0 + 0.1 * nrm(ks[6], (cout,), jnp.float32),
        "bt2": 0.1 * nrm(ks[7], (cout,), jnp.float32),
        "wd": 0.1 * nrm(ks[8], (cout, cin, 1, 1), jnp.float32),
        "bd": 0.1 * nrm(ks[9], (cout,), jnp.float32),
    }


if __name__ == "__main__":
    key = jax.random.PRNGKey(0)
    batch, cin, cout = 3, 4, 8
    h = w = 16
    num_blocks, stride_init = 1, 2   # ResnetLayer(4, 8, num_blocks=1, stride_init_block=2)

    keys = jax.random.split(key, 2 + num_blocks)
    x = jax.random.normal(keys[0], (batch, cin, h, w), dtype=jnp.float32)
    blocks = [_init_block_params(keys[1], cin, cout)]
    for i in range(num_blocks):
        blocks.append(_init_block_params(keys[2 + i], cout, cout))

    fwd = jax.jit(functools.partial(resnet_layer_forward,
                                    stride_init_block=stride_init))
    out = jax.block_until_ready(fwd(x, blocks))
    assert out.shape == (batch, cout, h // 2, w // 2), out.shape

    ref = jax.block_until_ready(_ref_resnet_layer(x, blocks, stride_init))
    err = float(jnp.max(jnp.abs(out - ref)))
    # bf16 MXU operands with f32 accumulation -> small numeric drift vs the f32 ref.
    assert jnp.allclose(out, ref, atol=5e-2, rtol=5e-2), err

    print("KERNEL_OK")
</pallas_src>

<mosaic_0001>
module attributes {stable_mosaic.version = 11 : i64} {
  func.func @_conv_matmul_kernel(%arg0: i32, %arg1: i32, %arg2: i32, %arg3: memref<64x1152xbf16, #tpu.memory_space<vmem>>, %arg4: memref<1152x128xbf16, #tpu.memory_space<vmem>>, %arg5: memref<1x128xf32, #tpu.memory_space<vmem>>, %arg6: memref<64x128xf32, #tpu.memory_space<vmem>>, %arg7: memref<8x128xf32, #tpu.memory_space<vmem>>, %arg8: memref<8x128xf32, #tpu.memory_space<vmem>>, %arg9: memref<64x128xf32, #tpu.memory_space<vmem>>) attributes {dimension_semantics = [#tpu.dimension_semantics<parallel>, #tpu.dimension_semantics<parallel>, #tpu.dimension_semantics<arbitrary>], iteration_bounds = array<i64: 3, 1, 1>, scalar_prefetch = 0 : i64, scratch_operands = 1 : i64, tpu.core_type = #tpu.core_type<tc>, window_params = [{transform_indices = @transform_0, window_bounds = array<i64: 64, 1152>}, {transform_indices = @transform_1, window_bounds = array<i64: 1152, 128>}, {transform_indices = @transform_2, window_bounds = array<i64: 1, 128>}, {transform_indices = @transform_3, window_bounds = array<i64: 64, 128>}, {transform_indices = @transform_4, window_bounds = array<i64: 8, 128>}, {transform_indices = @transform_5, window_bounds = array<i64: 8, 128>}]} {
    %c0_i32 = arith.constant 0 : i32
    %0 = arith.cmpi eq, %arg2, %c0_i32 : i32
    %1 = arith.extui %0 : i1 to i32
    %c0_i32_0 = arith.constant 0 : i32
    %2 = arith.cmpi ne, %1, %c0_i32_0 : i32
    scf.if %2 {
      %cst_10 = arith.constant 0.000000e+00 : f32
      %12 = vector.broadcast %cst_10 : f32 to vector<64x128xf32>
      %c0_11 = arith.constant 0 : index
      %c0_12 = arith.constant 0 : index
      %13 = vector.load %arg9[%c0_11, %c0_12] : memref<64x128xf32, #tpu.memory_space<vmem>>, vector<64x128xf32>
      tpu.vector_store %arg9[%c0_11, %c0_12], %12 {strides = array<i32>} : memref<64x128xf32, #tpu.memory_space<vmem>>, vector<64x128xf32>,
    } else {
    }
    %c0 = arith.constant 0 : index
    %c0_1 = arith.constant 0 : index
    %3 = vector.load %arg9[%c0, %c0_1] : memref<64x128xf32, #tpu.memory_space<vmem>>, vector<64x128xf32>
    %c0_2 = arith.constant 0 : index
    %c0_3 = arith.constant 0 : index
    %4 = vector.load %arg3[%c0_2, %c0_3] : memref<64x1152xbf16, #tpu.memory_space<vmem>>, vector<64x1152xbf16>
    %c0_4 = arith.constant 0 : index
    %c0_5 = arith.constant 0 : index
    %5 = vector.load %arg4[%c0_4, %c0_5] : memref<1152x128xbf16, #tpu.memory_space<vmem>>, vector<1152x128xbf16>
    %cst = arith.constant dense<0.000000e+00> : vector<64x128xf32>
    %6 = tpu.matmul %4, %5, %cst {dimension_numbers = #tpu.dot_dimension_numbers<[1], [0], [0], [1], [0, 0, 1, 1], [], []>} : vector<64x1152xbf16>, vector<1152x128xbf16>, vector<64x128xf32> -> vector<64x128xf32>
    %7 = arith.addf %3, %6 : vector<64x128xf32>
    %c0_6 = arith.constant 0 : index
    %c0_7 = arith.constant 0 : index
    %8 = vector.load %arg9[%c0_6, %c0_7] : memref<64x128xf32, #tpu.memory_space<vmem>>, vector<64x128xf32>
    tpu.vector_store %arg9[%c0_6, %c0_7], %7 {strides = array<i32>} : memref<64x128xf32, #tpu.memory_space<vmem>>, vector<64x128xf32>,
    %c0_i32_8 = arith.constant 0 : i32
    %9 = arith.cmpi eq, %arg2, %c0_i32_8 : i32
    %10 = arith.extui %9 : i1 to i32
    %c0_i32_9 = arith.constant 0 : i32
    %11 = arith.cmpi ne, %10, %c0_i32_9 : i32
    scf.if %11 {
      %c0_10 = arith.constant 0 : index
      %c0_11 = arith.constant 0 : index
      %12 = vector.load %arg9[%c0_10, %c0_11] : memref<64x128xf32, #tpu.memory_space<vmem>>, vector<64x128xf32>
      %c0_12 = arith.constant 0 : index
      %c0_13 = arith.constant 0 : index
      %13 = vector.load %arg5[%c0_12, %c0_13] : memref<1x128xf32, #tpu.memory_space<vmem>>, vector<1x128xf32>
      %14 = vector.broadcast %13 : vector<1x128xf32> to vector<64x128xf32>
      %15 = arith.addf %12, %14 : vector<64x128xf32>
      %c0_14 = arith.constant 0 : index
      %c0_15 = arith.constant 0 : index
      %16 = vector.load %arg6[%c0_14, %c0_15] : memref<64x128xf32, #tpu.memory_space<vmem>>, vector<64x128xf32>
      tpu.vector_store %arg6[%c0_14, %c0_15], %15 {strides = array<i32>} : memref<64x128xf32, #tpu.memory_space<vmem>>, vector<64x128xf32>,
      %cst_16 = arith.constant dense<0.000000e+00> : vector<128xf32>
      %17 = vector.multi_reduction <add>, %15, %cst_16 [0] : vector<64x128xf32> to vector<128xf32>
      %18 = vector.shape_cast %17 : vector<128xf32> to vector<1x128xf32>
      %19 = arith.mulf %15, %15 : vector<64x128xf32>
      %cst_17 = arith.constant dense<0.000000e+00> : vector<128xf32>
      %20 = vector.multi_reduction <add>, %19, %cst_17 [0] : vector<64x128xf32> to vector<128xf32>
      %21 = vector.shape_cast %20 : vector<128xf32> to vector<1x128xf32>
      %22 = vector.shape_cast %18 : vector<1x128xf32> to vector<1x128xf32>
      %23 = vector.broadcast %22 : vector<1x128xf32> to vector<8x128xf32>
      %c0_18 = arith.constant 0 : index
      %c0_19 = arith.constant 0 : index
      %24 = vector.load %arg7[%c0_18, %c0_19] : memref<8x128xf32, #tpu.memory_space<vmem>>, vector<8x128xf32>
      tpu.vector_store %arg7[%c0_18, %c0_19], %23 {strides = array<i32>} : memref<8x128xf32, #tpu.memory_space<vmem>>, vector<8x128xf32>,
      %25 = vector.shape_cast %21 : vector<1x128xf32> to vector<1x128xf32>
      %26 = vector.broadcast %25 : vector<1x128xf32> to vector<8x128xf32>
      %c0_20 = arith.constant 0 : index
      %c0_21 = arith.constant 0 : index
      %27 = vector.load %arg8[%c0_20, %c0_21] : memref<8x128xf32, #tpu.memory_space<vmem>>, vector<8x128xf32>
      tpu.vector_store %arg8[%c0_20, %c0_21], %26 {strides = array<i32>} : memref<8x128xf32, #tpu.memory_space<vmem>>, vector<8x128xf32>,
    } else {
    }
    return
  }
  func.func @transform_0(%arg0: i32, %arg1: i32, %arg2: i32) -> (i32, i32) {
    %c0_i32 = arith.constant 0 : i32
    return %arg0, %arg2 : i32, i32
  }
  func.func @transform_1(%arg0: i32, %arg1: i32, %arg2: i32) -> (i32, i32) {
    %c0_i32 = arith.constant 0 : i32
    return %arg2, %arg1 : i32, i32
  }
  func.func @transform_2(%arg0: i32, %arg1: i32, %arg2: i32) -> (i32, i32) {
    %c0_i32 = arith.constant 0 : i32
    %c0_i32_0 = arith.constant 0 : i32
    return %c0_i32, %arg1 : i32, i32
  }
  func.func @transform_3(%arg0: i32, %arg1: i32, %arg2: i32) -> (i32, i32) {
    %c0_i32 = arith.constant 0 : i32
    return %arg0, %arg1 : i32, i32
  }
  func.func @transform_4(%arg0: i32, %arg1: i32, %arg2: i32) -> (i32, i32) {
    %c0_i32 = arith.constant 0 : i32
    return %arg0, %arg1 : i32, i32
  }
  func.func @transform_5(%arg0: i32, %arg1: i32, %arg2: i32) -> (i32, i32) {
    %c0_i32 = arith.constant 0 : i32
    return %arg0, %arg1 : i32, i32
  }
}

module attributes {stable_mosaic.version = 11 : i64} {
  func.func @_scale_shift_kernel(%arg0: i32, %arg1: i32, %arg2: memref<64x128xf32, #tpu.memory_space<vmem>>, %arg3: memref<1x128xf32, #tpu.memory_space<vmem>>, %arg4: memref<1x128xf32, #tpu.memory_space<vmem>>, %arg5: memref<64x128xf32, #tpu.memory_space<vmem>>) attributes {dimension_semantics = [#tpu.dimension_semantics<parallel>, #tpu.dimension_semantics<parallel>], iteration_bounds = array<i64: 3, 1>, scalar_prefetch = 0 : i64, scratch_operands = 0 : i64, tpu.core_type = #tpu.core_type<tc>, window_params = [{transform_indices = @transform_0, window_bounds = array<i64: 64, 128>}, {transform_indices = @transform_1, window_bounds = array<i64: 1, 128>}, {transform_indices = @transform_2, window_bounds = array<i64: 1, 128>}, {transform_indices = @transform_3, window_bounds = array<i64: 64, 128>}]} {
    %c0 = arith.constant 0 : index
    %c0_0 = arith.constant 0 : index
    %0 = vector.load %arg2[%c0, %c0_0] : memref<64x128xf32, #tpu.memory_space<vmem>>, vector<64x128xf32>
    %c0_1 = arith.constant 0 : index
    %c0_2 = arith.constant 0 : index
    %1 = vector.load %arg3[%c0_1, %c0_2] : memref<1x128xf32, #tpu.memory_space<vmem>>, vector<1x128xf32>
    %2 = vector.broadcast %1 : vector<1x128xf32> to vector<64x128xf32>
    %3 = arith.mulf %0, %2 : vector<64x128xf32>
    %c0_3 = arith.constant 0 : index
    %c0_4 = arith.constant 0 : index
    %4 = vector.load %arg4[%c0_3, %c0_4] : memref<1x128xf32, #tpu.memory_space<vmem>>, vector<1x128xf32>
    %5 = vector.broadcast %4 : vector<1x128xf32> to vector<64x128xf32>
    %6 = arith.addf %3, %5 : vector<64x128xf32>
    %cst = arith.constant 0.000000e+00 : f32
    %7 = vector.broadcast %cst : f32 to vector<64x128xf32>
    %8 = arith.maximumf %6, %7 : vector<64x128xf32>
    %c0_5 = arith.constant 0 : index
    %c0_6 = arith.constant 0 : index
    %9 = vector.load %arg5[%c0_5, %c0_6] : memref<64x128xf32, #tpu.memory_space<vmem>>, vector<64x128xf32>
    tpu.vector_store %arg5[%c0_5, %c0_6], %8 {strides = array<i32>} : memref<64x128xf32, #tpu.memory_space<vmem>>, vector<64x128xf32>,
    return
  }
  func.func @transform_0(%arg0: i32, %arg1: i32) -> (i32, i32) {
    %c0_i32 = arith.constant 0 : i32
    return %arg0, %arg1 : i32, i32
  }
  func.func @transform_1(%arg0: i32, %arg1: i32) -> (i32, i32) {
    %c0_i32 = arith.constant 0 : i32
    %c0_i32_0 = arith.constant 0 : i32
    return %c0_i32, %arg1 : i32, i32
  }
  func.func @transform_2(%arg0: i32, %arg1: i32) -> (i32, i32) {
    %c0_i32 = arith.constant 0 : i32
    %c0_i32_0 = arith.constant 0 : i32
    return %c0_i32, %arg1 : i32, i32
  }
  func.func @transform_3(%arg0: i32, %arg1: i32) -> (i32, i32) {
    %c0_i32 = arith.constant 0 : i32
    return %arg0, %arg1 : i32, i32
  }
}

module attributes {stable_mosaic.version = 11 : i64} {
  func.func @_scale_shift_add_kernel(%arg0: i32, %arg1: i32, %arg2: memref<64x128xf32, #tpu.memory_space<vmem>>, %arg3: memref<1x128xf32, #tpu.memory_space<vmem>>, %arg4: memref<1x128xf32, #tpu.memory_space<vmem>>, %arg5: memref<64x128xf32, #tpu.memory_space<vmem>>, %arg6: memref<64x128xf32, #tpu.memory_space<vmem>>) attributes {dimension_semantics = [#tpu.dimension_semantics<parallel>, #tpu.dimension_semantics<parallel>], iteration_bounds = array<i64: 3, 1>, scalar_prefetch = 0 : i64, scratch_operands = 0 : i64, tpu.core_type = #tpu.core_type<tc>, window_params = [{transform_indices = @transform_0, window_bounds = array<i64: 64, 128>}, {transform_indices = @transform_1, window_bounds = array<i64: 1, 128>}, {transform_indices = @transform_2, window_bounds = array<i64: 1, 128>}, {transform_indices = @transform_3, window_bounds = array<i64: 64, 128>}, {transform_indices = @transform_4, window_bounds = array<i64: 64, 128>}]} {
    %c0 = arith.constant 0 : index
    %c0_0 = arith.constant 0 : index
    %0 = vector.load %arg2[%c0, %c0_0] : memref<64x128xf32, #tpu.memory_space<vmem>>, vector<64x128xf32>
    %c0_1 = arith.constant 0 : index
    %c0_2 = arith.constant 0 : index
    %1 = vector.load %arg3[%c0_1, %c0_2] : memref<1x128xf32, #tpu.memory_space<vmem>>, vector<1x128xf32>
    %2 = vector.broadcast %1 : vector<1x128xf32> to vector<64x128xf32>
    %3 = arith.mulf %0, %2 : vector<64x128xf32>
    %c0_3 = arith.constant 0 : index
    %c0_4 = arith.constant 0 : index
    %4 = vector.load %arg4[%c0_3, %c0_4] : memref<1x128xf32, #tpu.memory_space<vmem>>, vector<1x128xf32>
    %5 = vector.broadcast %4 : vector<1x128xf32> to vector<64x128xf32>
    %6 = arith.addf %3, %5 : vector<64x128xf32>
    %c0_5 = arith.constant 0 : index
    %c0_6 = arith.constant 0 : index
    %7 = vector.load %arg5[%c0_5, %c0_6] : memref<64x128xf32, #tpu.memory_space<vmem>>, vector<64x128xf32>
    %8 = arith.addf %6, %7 : vector<64x128xf32>
    %cst = arith.constant 0.000000e+00 : f32
    %9 = vector.broadcast %cst : f32 to vector<64x128xf32>
    %10 = arith.maximumf %8, %9 : vector<64x128xf32>
    %c0_7 = arith.constant 0 : index
    %c0_8 = arith.constant 0 : index
    %11 = vector.load %arg6[%c0_7, %c0_8] : memref<64x128xf32, #tpu.memory_space<vmem>>, vector<64x128xf32>
    tpu.vector_store %arg6[%c0_7, %c0_8], %10 {strides = array<i32>} : memref<64x128xf32, #tpu.memory_space<vmem>>, vector<64x128xf32>,
    return
  }
  func.func @transform_0(%arg0: i32, %arg1: i32) -> (i32, i32) {
    %c0_i32 = arith.constant 0 : i32
    return %arg0, %arg1 : i32, i32
  }
  func.func @transform_1(%arg0: i32, %arg1: i32) -> (i32, i32) {
    %c0_i32 = arith.constant 0 : i32
    %c0_i32_0 = arith.constant 0 : i32
    return %c0_i32, %arg1 : i32, i32
  }
  func.func @transform_2(%arg0: i32, %arg1: i32) -> (i32, i32) {
    %c0_i32 = arith.constant 0 : i32
    %c0_i32_0 = arith.constant 0 : i32
    return %c0_i32, %arg1 : i32, i32
  }
  func.func @transform_3(%arg0: i32, %arg1: i32) -> (i32, i32) {
    %c0_i32 = arith.constant 0 : i32
    return %arg0, %arg1 : i32, i32
  }
  func.func @transform_4(%arg0: i32, %arg1: i32) -> (i32, i32) {
    %c0_i32 = arith.constant 0 : i32
    return %arg0, %arg1 : i32, i32
  }
}

module attributes {stable_mosaic.version = 11 : i64} {
  func.func @_conv_matmul_kernel(%arg0: i32, %arg1: i32, %arg2: i32, %arg3: memref<64x128xbf16, #tpu.memory_space<vmem>>, %arg4: memref<128x128xbf16, #tpu.memory_space<vmem>>, %arg5: memref<1x128xf32, #tpu.memory_space<vmem>>, %arg6: memref<64x128xf32, #tpu.memory_space<vmem>>, %arg7: memref<8x128xf32, #tpu.memory_space<vmem>>, %arg8: memref<8x128xf32, #tpu.memory_space<vmem>>, %arg9: memref<64x128xf32, #tpu.memory_space<vmem>>) attributes {dimension_semantics = [#tpu.dimension_semantics<parallel>, #tpu.dimension_semantics<parallel>, #tpu.dimension_semantics<arbitrary>], iteration_bounds = array<i64: 3, 1, 1>, scalar_prefetch = 0 : i64, scratch_operands = 1 : i64, tpu.core_type = #tpu.core_type<tc>, window_params = [{transform_indices = @transform_0, window_bounds = array<i64: 64, 128>}, {transform_indices = @transform_1, window_bounds = array<i64: 128, 128>}, {transform_indices = @transform_2, window_bounds = array<i64: 1, 128>}, {transform_indices = @transform_3, window_bounds = array<i64: 64, 128>}, {transform_indices = @transform_4, window_bounds = array<i64: 8, 128>}, {transform_indices = @transform_5, window_bounds = array<i64: 8, 128>}]} {
    %c0_i32 = arith.constant 0 : i32
    %0 = arith.cmpi eq, %arg2, %c0_i32 : i32
    %1 = arith.extui %0 : i1 to i32
    %c0_i32_0 = arith.constant 0 : i32
    %2 = arith.cmpi ne, %1, %c0_i32_0 : i32
    scf.if %2 {
      %cst_10 = arith.constant 0.000000e+00 : f32
      %12 = vector.broadcast %cst_10 : f32 to vector<64x128xf32>
      %c0_11 = arith.constant 0 : index
      %c0_12 = arith.constant 0 : index
      %13 = vector.load %arg9[%c0_11, %c0_12] : memref<64x128xf32, #tpu.memory_space<vmem>>, vector<64x128xf32>
      tpu.vector_store %arg9[%c0_11, %c0_12], %12 {strides = array<i32>} : memref<64x128xf32, #tpu.memory_space<vmem>>, vector<64x128xf32>,
    } else {
    }
    %c0 = arith.constant 0 : index
    %c0_1 = arith.constant 0 : index
    %3 = vector.load %arg9[%c0, %c0_1] : memref<64x128xf32, #tpu.memory_space<vmem>>, vector<64x128xf32>
    %c0_2 = arith.constant 0 : index
    %c0_3 = arith.constant 0 : index
    %4 = vector.load %arg3[%c0_2, %c0_3] : memref<64x128xbf16, #tpu.memory_space<vmem>>, vector<64x128xbf16>
    %c0_4 = arith.constant 0 : index
    %c0_5 = arith.constant 0 : index
    %5 = vector.load %arg4[%c0_4, %c0_5] : memref<128x128xbf16, #tpu.memory_space<vmem>>, vector<128x128xbf16>
    %cst = arith.constant dense<0.000000e+00> : vector<64x128xf32>
    %6 = tpu.matmul %4, %5, %cst {dimension_numbers = #tpu.dot_dimension_numbers<[1], [0], [0], [1], [0, 0, 1, 1], [], []>} : vector<64x128xbf16>, vector<128x128xbf16>, vector<64x128xf32> -> vector<64x128xf32>
    %7 = arith.addf %3, %6 : vector<64x128xf32>
    %c0_6 = arith.constant 0 : index
    %c0_7 = arith.constant 0 : index
    %8 = vector.load %arg9[%c0_6, %c0_7] : memref<64x128xf32, #tpu.memory_space<vmem>>, vector<64x128xf32>
    tpu.vector_store %arg9[%c0_6, %c0_7], %7 {strides = array<i32>} : memref<64x128xf32, #tpu.memory_space<vmem>>, vector<64x128xf32>,
    %c0_i32_8 = arith.constant 0 : i32
    %9 = arith.cmpi eq, %arg2, %c0_i32_8 : i32
    %10 = arith.extui %9 : i1 to i32
    %c0_i32_9 = arith.constant 0 : i32
    %11 = arith.cmpi ne, %10, %c0_i32_9 : i32
    scf.if %11 {
      %c0_10 = arith.constant 0 : index
      %c0_11 = arith.constant 0 : index
      %12 = vector.load %arg9[%c0_10, %c0_11] : memref<64x128xf32, #tpu.memory_space<vmem>>, vector<64x128xf32>
      %c0_12 = arith.constant 0 : index
      %c0_13 = arith.constant 0 : index
      %13 = vector.load %arg5[%c0_12, %c0_13] : memref<1x128xf32, #tpu.memory_space<vmem>>, vector<1x128xf32>
      %14 = vector.broadcast %13 : vector<1x128xf32> to vector<64x128xf32>
      %15 = arith.addf %12, %14 : vector<64x128xf32>
      %c0_14 = arith.constant 0 : index
      %c0_15 = arith.constant 0 : index
      %16 = vector.load %arg6[%c0_14, %c0_15] : memref<64x128xf32, #tpu.memory_space<vmem>>, vector<64x128xf32>
      tpu.vector_store %arg6[%c0_14, %c0_15], %15 {strides = array<i32>} : memref<64x128xf32, #tpu.memory_space<vmem>>, vector<64x128xf32>,
      %cst_16 = arith.constant dense<0.000000e+00> : vector<128xf32>
      %17 = vector.multi_reduction <add>, %15, %cst_16 [0] : vector<64x128xf32> to vector<128xf32>
      %18 = vector.shape_cast %17 : vector<128xf32> to vector<1x128xf32>
      %19 = arith.mulf %15, %15 : vector<64x128xf32>
      %cst_17 = arith.constant dense<0.000000e+00> : vector<128xf32>
      %20 = vector.multi_reduction <add>, %19, %cst_17 [0] : vector<64x128xf32> to vector<128xf32>
      %21 = vector.shape_cast %20 : vector<128xf32> to vector<1x128xf32>
      %22 = vector.shape_cast %18 : vector<1x128xf32> to vector<1x128xf32>
      %23 = vector.broadcast %22 : vector<1x128xf32> to vector<8x128xf32>
      %c0_18 = arith.constant 0 : index
      %c0_19 = arith.constant 0 : index
      %24 = vector.load %arg7[%c0_18, %c0_19] : memref<8x128xf32, #tpu.memory_space<vmem>>, vector<8x128xf32>
      tpu.vector_store %arg7[%c0_18, %c0_19], %23 {strides = array<i32>} : memref<8x128xf32, #tpu.memory_space<vmem>>, vector<8x128xf32>,
      %25 = vector.shape_cast %21 : vector<1x128xf32> to vector<1x128xf32>
      %26 = vector.broadcast %25 : vector<1x128xf32> to vector<8x128xf32>
      %c0_20 = arith.constant 0 : index
      %c0_21 = arith.constant 0 : index
      %27 = vector.load %arg8[%c0_20, %c0_21] : memref<8x128xf32, #tpu.memory_space<vmem>>, vector<8x128xf32>
      tpu.vector_store %arg8[%c0_20, %c0_21], %26 {strides = array<i32>} : memref<8x128xf32, #tpu.memory_space<vmem>>, vector<8x128xf32>,
    } else {
    }
    return
  }
  func.func @transform_0(%arg0: i32, %arg1: i32, %arg2: i32) -> (i32, i32) {
    %c0_i32 = arith.constant 0 : i32
    return %arg0, %arg2 : i32, i32
  }
  func.func @transform_1(%arg0: i32, %arg1: i32, %arg2: i32) -> (i32, i32) {
    %c0_i32 = arith.constant 0 : i32
    return %arg2, %arg1 : i32, i32
  }
  func.func @transform_2(%arg0: i32, %arg1: i32, %arg2: i32) -> (i32, i32) {
    %c0_i32 = arith.constant 0 : i32
    %c0_i32_0 = arith.constant 0 : i32
    return %c0_i32, %arg1 : i32, i32
  }
  func.func @transform_3(%arg0: i32, %arg1: i32, %arg2: i32) -> (i32, i32) {
    %c0_i32 = arith.constant 0 : i32
    return %arg0, %arg1 : i32, i32
  }
  func.func @transform_4(%arg0: i32, %arg1: i32, %arg2: i32) -> (i32, i32) {
    %c0_i32 = arith.constant 0 : i32
    return %arg0, %arg1 : i32, i32
  }
  func.func @transform_5(%arg0: i32, %arg1: i32, %arg2: i32) -> (i32, i32) {
    %c0_i32 = arith.constant 0 : i32
    return %arg0, %arg1 : i32, i32
  }
}

</mosaic_0001>

<bundles_post_ra>
// kernel: resnet_layer_forward.10
= control target key start
LH: loop header
LB: loop body
LE: loop exit
PB: predicated region body
PF: predicated region fallthrough
CT: control target
= control target key end

     0   :  { %s472_s12 = smov 0   ;;  %s474_s13 = smov 0   ;;  %s511_s0 = inlined_call_operand.vmem [shape: f32[192,128], index: 0, kind: input, shape index: {}]   ;;  %s512_s1 = inlined_call_operand.vmem [shape: f32[1,128], index: 1, kind: input, shape index: {}]   ;;  %s513_s2 = inlined_call_operand.vmem [shape: f32[1,128], index: 2, kind: input, shape index: {}]   ;;  %s514_s3 = inlined_call_operand.vmem [shape: f32[192,128], index: 3, kind: output, shape index: {}]  }
   0x1   :  { %s476_s14 = smov 0  }
   0x2 LB: > { %s25_s15 = sadd.s32 1, %s446_s13  ;;  %p395_p0 = scmp.ge.s32.totalorder %s450_s14, 1  ;;  %s450_s14 = sphi %s476_s14, %s13_s14   ;;  %s446_s13 = sphi %s474_s13, %s516_s13   ;;  %s442_s12 = sphi %s472_s12, %s515_s12  }
   0x3   : > { %p27_p1 = scmp.ge.s32.totalorder %s25_s15, 3  ;;  %p173_p2 = scmp.lt.s32.totalorder %s450_s14, 4 }
   0x5   : > { %s518_s15 = smov (%p27_p1, %s25_s15), 0  ;;  %p174_p3 = pnand %p395_p0, %p173_p2 }
   0x6   : > { %s396_s16 = sshll.u32 (!%p174_p3), %s442_s12, 3  ;;  %v400_v0 = vld [vmem:[%s512_s1] ss:$0 sm:$0xff] (!%p174_p3) }
   0x7   : > { %177 = sbr.rel (%p174_p3) target bundleno = 28 (0x1c), region = 32  ;;  %p210_p4 = scmp.lt.s32.totalorder (!%p174_p3), %s396_s16, 23  ;;  %v401_v1 = vld [vmem:[%s513_s2] ss:$0 sm:$0xff] (!%p174_p3) }
   0xe   : > { %s520_s16 = smov (!%p210_p4, %s396_s16), 23 }
   0xf   : > { %s397_s17 = sshll.u32 %s520_s16, 3 }
  0x10   : > { %s216_s22 = scalar_lea.vmem %s511_s0, %s397_s17  ;;  %s231_s27 = scalar_lea.vmem %s514_s3, %s397_s17 }
  0x11   : > { %v233_v2 = vld [vmem:[%s216_s22] sm:$0xff]  ;;  %v234_v3 = vld [vmem:[%s216_s22 + $0x8] sm:$0xff]  ;;  %v235_v4 = vld [vmem:[%s216_s22 + $0x10] sm:$0xff] }
  0x12   : > { %v248_v5 = vmul.f32 %v400_v0, %v233_v2  ;;  %v249_v6 = vmul.f32 %v400_v0, %v234_v3  ;;  %v250_v7 = vmul.f32 %v400_v0, %v235_v4  ;;  %v236_v8 = vld [vmem:[%s216_s22 + $0x18] sm:$0xff]  ;;  %v237_v9 = vld [vmem:[%s216_s22 + $0x20] sm:$0xff]  ;;  %v238_v10 = vld [vmem:[%s216_s22 + $0x28] sm:$0xff] }
  0x13   : > { %v251_v11 = vmul.f32 %v400_v0, %v236_v8  ;;  %v252_v12 = vmul.f32 %v400_v0, %v237_v9  ;;  %v253_v13 = vmul.f32 %v400_v0, %v238_v10  ;;  %v239_v14 = vld [vmem:[%s216_s22 + $0x30] sm:$0xff]  ;;  %v240_v15 = vld [vmem:[%s216_s22 + $0x38] sm:$0xff] }
  0x14   : > { %v263_v16 = vadd.f32 %v401_v1, %v248_v5  ;;  %v264_v17 = vadd.f32 %v401_v1, %v249_v6  ;;  %v265_v18 = vadd.f32 %v401_v1, %v250_v7  ;;  %v254_v19 = vmul.f32 %v400_v0, %v239_v14 }
  0x15   : > { %v266_v20 = vadd.f32 %v401_v1, %v251_v11  ;;  %v267_v21 = vadd.f32 %v401_v1, %v252_v12  ;;  %v268_v22 = vadd.f32 %v401_v1, %v253_v13  ;;  %v255_v23 = vmul.f32 %v400_v0, %v240_v15 }
  0x16   : > { %v271_v24 = vmax.f32 %v263_v16, 0.0  ;;  %v272_v25 = vmax.f32 %v264_v17, 0.0  ;;  %v273_v26 = vmax.f32 %v265_v18, 0.0  ;;  %v269_v27 = vadd.f32 %v401_v1, %v254_v19 }
  0x17   : > { %v274_v28 = vmax.f32 %v266_v20, 0.0  ;;  %v275_v29 = vmax.f32 %v267_v21, 0.0  ;;  %v276_v30 = vmax.f32 %v268_v22, 0.0  ;;  %v270_v31 = vadd.f32 %v401_v1, %v255_v23 }
  0x18   : > { %279 = vst [vmem:[%s231_s27] sm:$0xff] %v271_v24  ;;  %280 = vst [vmem:[%s231_s27 + $0x8] sm:$0xff] %v272_v25  ;;  %v277_v32 = vmax.f32 %v269_v27, 0.0 }
  0x19   : > { %281 = vst [vmem:[%s231_s27 + $0x10] sm:$0xff] %v273_v26  ;;  %282 = vst [vmem:[%s231_s27 + $0x18] sm:$0xff] %v274_v28  ;;  %v278_v33 = vmax.f32 %v270_v31, 0.0 }
  0x1a   : > { %283 = vst [vmem:[%s231_s27 + $0x20] sm:$0xff] %v275_v29  ;;  %284 = vst [vmem:[%s231_s27 + $0x28] sm:$0xff] %v276_v30 }
  0x1b   : > { %285 = vst [vmem:[%s231_s27 + $0x30] sm:$0xff] %v277_v32  ;;  %286 = vst [vmem:[%s231_s27 + $0x38] sm:$0xff] %v278_v33 }
  0x1c PF: > { %s13_s14 = sadd.s32 1, %s450_s14   ;;  %s515_s12 = smov %s446_s13 }
  0x1d   : > { %p10_p5 = scmp.ge.s32.totalorder %s13_s14, 5   ;;  %s516_s13 = smov %s518_s15 }
  0x1f   :  { %12 = sbr.rel (!%p10_p5) target bundleno = 2 (0x2), region = 68 }

// kernel: resnet_layer_forward.9
= control target key start
LH: loop header
LB: loop body
LE: loop exit
PB: predicated region body
PF: predicated region fallthrough
CT: control target
= control target key end

     0   :  { %s2325_s18 = smov 0   ;;  %s2327_s19 = smov 0   ;;  %s2643_s0 = inlined_call_operand.vmem [shape: bf16[192,1152], index: 0, kind: input, shape index: {}]   ;;  %s2644_s1 = inlined_call_operand.vmem [shape: bf16[1152,128], index: 1, kind: input, shape index: {}]   ;;  %s2645_s2 = inlined_call_operand.vmem [shape: f32[1,128], index: 2, kind: input, shape index: {}]   ;;  %s2646_s3 = inlined_call_operand.vmem [shape: f32[192,128], index: 3, kind: output, shape index: {0}]   ;;  %s2647_s4 = inlined_call_operand.vmem [shape: f32[24,128], index: 4, kind: output, shape index: {1}]   ;;  %s2648_s5 = inlined_call_operand.vmem [shape: f32[24,128], index: 5, kind: output, shape index: {2}]  }
   0x1   :  { %s2329_s20 = smov 0  }
   0x2 LB: > { %s35_s21 = sadd.s32 1, %s2289_s19  ;;  %p1792_p0 = scmp.ge.s32.totalorder %s2293_s20, 1  ;;  %s2293_s20 = sphi %s2329_s20, %s16_s20   ;;  %s2289_s19 = sphi %s2327_s19, %s2650_s19   ;;  %s2285_s18 = sphi %s2325_s18, %s2649_s18  }
   0x3   : > { %p37_p1 = scmp.ge.s32.totalorder %s35_s21, 3  ;;  %p250_p2 = scmp.lt.s32.totalorder %s2293_s20, 4 }
   0x5   : > { %s2652_s21 = smov (%p37_p1, %s35_s21), 0  ;;  %p251_p3 = pnand %p1792_p0, %p250_p2 }
   0x6   : > { %v2147_v0 = vld [vmem:[%s2644_s1 + $0x40] sm:$0xff] (!%p251_p3)   ;;  %v2151_v4 = vld [vmem:[%s2644_s1 + $0x48] sm:$0xff] (!%p251_p3)   ;;  %v2155_v8 = vld [vmem:[%s2644_s1 + $0x50] sm:$0xff] (!%p251_p3)   ;;  %s1793_s6 = sshll.u32 (!%p251_p3), %s2285_s18, 3  ;;  %p344_p5 = scmp.lt.s32.totalorder (!%p251_p3), %s2285_s18, 2 }
   0x7   : > { %254 = sbr.rel (%p251_p3) target bundleno = 353 (0x161), region = 32  ;;  %v2148_v1 = vld [vmem:[%s2644_s1 + $0xc0] sm:$0xff] (!%p251_p3)   ;;  %1910 = vmatprep.subr.bf16.mxu0 (!%p251_p3), %v2147_v0  ;;  %v2152_v5 = vld [vmem:[%s2644_s1 + $0xc8] sm:$0xff] (!%p251_p3)   ;;  %v2156_v9 = vld [vmem:[%s2644_s1 + $0xd0] sm:$0xff] (!%p251_p3)   ;;  %p313_p4 = scmp.lt.s32.totalorder (!%p251_p3), %s1793_s6, 23 }
   0x8   : > { %v2149_v2 = vld [vmem:[%s2644_s1] sm:$0xff] (!%p251_p3)   ;;  %1950 = vmatprep.subr.bf16.mxu1 (!%p251_p3), %v2148_v1  ;;  %v2153_v6 = vld [vmem:[%s2644_s1 + $0x8] sm:$0xff] (!%p251_p3)   ;;  %v2157_v10 = vld [vmem:[%s2644_s1 + $0x10] sm:$0xff] (!%p251_p3)  }
   0x9   : > { %v2150_v3 = vld [vmem:[%s2644_s1 + $0x80] sm:$0xff] (!%p251_p3)   ;;  %1911 = vmatpush3.bf16.msra.mxu0 (!%p251_p3), %v2149_v2  ;;  %v2154_v7 = vld [vmem:[%s2644_s1 + $0x88] sm:$0xff] (!%p251_p3)   ;;  %v2158_v11 = vld [vmem:[%s2644_s1 + $0x90] sm:$0xff] (!%p251_p3)  }
   0xa   : > { %1951 = vmatpush3.bf16.msra.mxu1 (!%p251_p3), %v2150_v3  ;;  %1912 = vmatprep.subr.bf16.mxu0 (!%p251_p3), %v2151_v4  ;;  %v2159_v12 = vld [vmem:[%s2644_s1 + $0x58] sm:$0xff] (!%p251_p3)   ;;  %v2163_v16 = vld [vmem:[%s2644_s1 + $0x60] sm:$0xff] (!%p251_p3)   ;;  %v2167_v20 = vld [vmem:[%s2644_s1 + $0x68] sm:$0xff] (!%p251_p3)  }
   0xb   : > { %1952 = vmatprep.subr.bf16.mxu1 (!%p251_p3), %v2152_v5  ;;  %v2160_v13 = vld [vmem:[%s2644_s1 + $0xd8] sm:$0xff] (!%p251_p3)   ;;  %v2164_v17 = vld [vmem:[%s2644_s1 + $0xe0] sm:$0xff] (!%p251_p3)   ;;  %v2168_v21 = vld [vmem:[%s2644_s1 + $0xe8] sm:$0xff] (!%p251_p3)  }
   0xc   : > { %v2161_v14 = vld [vmem:[%s2644_s1 + $0x18] sm:$0xff] (!%p251_p3)   ;;  %v2165_v18 = vld [vmem:[%s2644_s1 + $0x20] sm:$0xff] (!%p251_p3)   ;;  %v2169_v22 = vld [vmem:[%s2644_s1 + $0x28] sm:$0xff] (!%p251_p3)  }
   0xd   : > { %1913 = vmatpush3.bf16.msra.mxu0 (!%p251_p3), %v2153_v6  ;;  %v2162_v15 = vld [vmem:[%s2644_s1 + $0x98] sm:$0xff] (!%p251_p3)   ;;  %v2166_v19 = vld [vmem:[%s2644_s1 + $0xa0] sm:$0xff] (!%p251_p3)   ;;  %v2170_v23 = vld [vmem:[%s2644_s1 + $0xa8] sm:$0xff] (!%p251_p3)  }
   0xe   : > { %1953 = vmatpush3.bf16.msra.mxu1 %v2154_v7  ;;  %1914 = vmatprep.subr.bf16.mxu0 %v2155_v8  ;;  %s2654_s6 = smov (!%p313_p4, %s1793_s6), 23  ;;  %v2171_v24 = vld [vmem:[%s2644_s1 + $0x70] sm:$0xff]   ;;  %v2175_v28 = vld [vmem:[%s2644_s1 + $0x78] sm:$0xff]   ;;  %v2185_v36 = vld [vmem:[%s2644_s1 + $0x140] sm:$0xff]   ;;  %s2656_s18 = smov (!%p344_p5, %s2285_s18), 2 }
   0xf   : > { %1954 = vmatprep.subr.bf16.mxu1 %v2156_v9  ;;  %v2172_v25 = vld [vmem:[%s2644_s1 + $0xf0] sm:$0xff]   ;;  %s2122_s9 = smul.u32 36, %s2654_s6  ;;  %v2176_v29 = vld [vmem:[%s2644_s1 + $0xf8] sm:$0xff]   ;;  %v2186_v37 = vld [vmem:[%s2644_s1 + $0x1c0] sm:$0xff]  }
  0x10   : > { %v2173_v26 = vld [vmem:[%s2644_s1 + $0x30] sm:$0xff]   ;;  %v2177_v30 = vld [vmem:[%s2644_s1 + $0x38] sm:$0xff]   ;;  %v2187_v38 = vld [vmem:[%s2644_s1 + $0x100] sm:$0xff]  }
  0x11   : > { %1915 = vmatpush3.bf16.msra.mxu0 %v2157_v10  ;;  %v2174_v27 = vld [vmem:[%s2644_s1 + $0xb0] sm:$0xff]   ;;  %s2442_s24 = scalar_lea.vmem %s2643_s0, %s2122_s9  ;;  %v2178_v31 = vld [vmem:[%s2644_s1 + $0xb8] sm:$0xff]   ;;  %v2188_v39 = vld [vmem:[%s2644_s1 + $0x180] sm:$0xff]  }
  0x12   : > { %1955 = vmatpush3.bf16.msra.mxu1 %v2158_v11  ;;  %1916 = vmatprep.subr.bf16.mxu0 %v2159_v12  ;;  %v2179_v32 = vld [vmem:[%s2442_s24] ss:$36 sps:$4 sm:$0xff]   ;;  %v2182_v34 = vld [vmem:[%s2442_s24 + $0x8] ss:$36 sps:$4 sm:$0xff]   ;;  %v2195_v45 = vld [vmem:[%s2442_s24 + $0x54] ss:$36 sps:$4 sm:$0xff]  }
  0x13   : > { %1956 = vmatprep.subr.bf16.mxu1 %v2160_v13  ;;  %v2181_v33 = vld [vmem:[%s2442_s24 + $0x4] ss:$36 sps:$4 sm:$0xff]   ;;  %v2184_v35 = vld [vmem:[%s2442_s24 + $0xc] ss:$36 sps:$4 sm:$0xff]   ;;  %v2203_v52 = vld [vmem:[%s2644_s1 + $0x158] sm:$0xff]  }
  0x14   : > { %1211 = vmatprep.mubr.bf16.mxu0 %v2181_v33  ;;  %1276 = vmatprep.mubr.bf16.mxu1 %v2184_v35  ;;  %v2189_v40 = vld [vmem:[%s2644_s1 + $0x148] sm:$0xff]   ;;  %v2198_v47 = vld [vmem:[%s2442_s24 + $0x50] ss:$36 sps:$4 sm:$0xff]   ;;  %v2204_v53 = vld [vmem:[%s2644_s1 + $0x1d8] sm:$0xff]  }
  0x15   : > { %1917 = vmatpush3.bf16.msra.mxu0 %v2161_v14  ;;  %v2190_v41 = vld [vmem:[%s2644_s1 + $0x1c8] sm:$0xff]   ;;  %v2199_v48 = vld [vmem:[%s2644_s1 + $0x150] sm:$0xff]   ;;  %v2205_v54 = vld [vmem:[%s2644_s1 + $0x118] sm:$0xff]  }
  0x16   : > { %1957 = vmatpush3.bf16.msra.mxu1 %v2162_v15  ;;  %1918 = vmatprep.subr.bf16.mxu0 %v2163_v16  ;;  %v2191_v42 = vld [vmem:[%s2644_s1 + $0x108] sm:$0xff]   ;;  %v2200_v49 = vld [vmem:[%s2644_s1 + $0x1d0] sm:$0xff]   ;;  %v2206_v55 = vld [vmem:[%s2644_s1 + $0x198] sm:$0xff]  }
  0x17   : > { %1958 = vmatprep.subr.bf16.mxu1 %v2164_v17  ;;  %v2192_v43 = vld [vmem:[%s2644_s1 + $0x188] sm:$0xff]   ;;  %v2201_v50 = vld [vmem:[%s2644_s1 + $0x110] sm:$0xff]   ;;  %v2209_v57 = vld [vmem:[%s2442_s24 + $0x9c] ss:$36 sps:$4 sm:$0xff]  }
  0x18   : > { %v2193_v44 = vld [vmem:[%s2442_s24 + $0x4c] ss:$36 sps:$4 sm:$0xff]   ;;  %v2207_v56 = vld [vmem:[%s2442_s24 + $0x94] ss:$36 sps:$4 sm:$0xff]   ;;  %v2213_v60 = vld [vmem:[%s2644_s1 + $0x160] sm:$0xff]  }
  0x19   : > { %1919 = vmatpush3.bf16.msra.mxu0 %v2165_v18  ;;  %v2197_v46 = vld [vmem:[%s2442_s24 + $0x48] ss:$36 sps:$4 sm:$0xff]   ;;  %v2202_v51 = vld [vmem:[%s2644_s1 + $0x190] sm:$0xff]   ;;  %v2212_v59 = vld [vmem:[%s2442_s24 + $0x98] ss:$36 sps:$4 sm:$0xff]  }
  0x1a   : > { %1959 = vmatpush3.bf16.msra.mxu1 %v2166_v19  ;;  %1920 = vmatprep.subr.bf16.mxu0 %v2167_v20  ;;  %v2211_v58 = vld [vmem:[%s2442_s24 + $0x90] ss:$36 sps:$4 sm:$0xff]   ;;  %v2214_v61 = vld [vmem:[%s2644_s1 + $0x1e0] sm:$0xff]   ;;  %v2217_v0 = vld [vmem:[%s2644_s1 + $0x168] sm:$0xff]  }
  0x1b   : > { %1960 = vmatprep.subr.bf16.mxu1 %v2168_v21  ;;  %v2215_v62 = vld [vmem:[%s2644_s1 + $0x120] sm:$0xff]   ;;  %v2218_v1 = vld [vmem:[%s2644_s1 + $0x1e8] sm:$0xff]   ;;  %v2225_v6 = vld [vmem:[%s2442_s24 + $0xd8] ss:$36 sps:$4 sm:$0xff]  }
  0x1c   : > { %v2216_v63 = vld [vmem:[%s2644_s1 + $0x1a0] sm:$0xff]   ;;  %v2219_v2 = vld [vmem:[%s2644_s1 + $0x128] sm:$0xff]   ;;  %v2227_v8 = vld [vmem:[%s2644_s1 + $0x170] sm:$0xff]  }
  0x1d   : > { %1921 = vmatpush3.bf16.msra.mxu0 %v2169_v22  ;;  %v2220_v3 = vld [vmem:[%s2644_s1 + $0x1a8] sm:$0xff]   ;;  %v2221_v4 = vld [vmem:[%s2442_s24 + $0xdc] ss:$36 sps:$4 sm:$0xff]   ;;  %v2228_v9 = vld [vmem:[%s2644_s1 + $0x1f0] sm:$0xff]  }
  0x1e   : > { %1961 = vmatpush3.bf16.msra.mxu1 %v2170_v23  ;;  %1922 = vmatprep.subr.bf16.mxu0 %v2171_v24  ;;  %v2223_v5 = vld [vmem:[%s2442_s24 + $0xe4] ss:$36 sps:$4 sm:$0xff]   ;;  %v2229_v10 = vld [vmem:[%s2644_s1 + $0x130] sm:$0xff]   ;;  %v2231_v12 = vld [vmem:[%s2644_s1 + $0x178] sm:$0xff]  }
  0x1f   : > { %1962 = vmatprep.subr.bf16.mxu1 %v2172_v25  ;;  %v2226_v7 = vld [vmem:[%s2442_s24 + $0xe0] ss:$36 sps:$4 sm:$0xff]   ;;  %v2230_v11 = vld [vmem:[%s2644_s1 + $0x1b0] sm:$0xff]   ;;  %v2232_v13 = vld [vmem:[%s2644_s1 + $0x1f8] sm:$0xff]  }
  0x20   : > { %v2233_v14 = vld [vmem:[%s2644_s1 + $0x138] sm:$0xff]   ;;  %v2235_v16 = vld [vmem:[%s2442_s24 + $0x10] ss:$36 sps:$4 sm:$0xff]   ;;  %v2241_v20 = vld [vmem:[%s2644_s1 + $0x200] sm:$0xff]  }
  0x21   : > { %1923 = vmatpush3.bf16.msra.mxu0 %v2173_v26  ;;  %v2234_v15 = vld [vmem:[%s2644_s1 + $0x1b8] sm:$0xff]   ;;  %v2242_v21 = vld [vmem:[%s2644_s1 + $0x208] sm:$0xff]   ;;  %v2248_v25 = vld [vmem:[%s2442_s24 + $0x60] ss:$36 sps:$4 sm:$0xff]  }
  0x22   : > { %1963 = vmatpush3.bf16.msra.mxu1 %v2174_v27  ;;  %1924 = vmatprep.subr.bf16.mxu0 %v2175_v28  ;;  %v2237_v17 = vld [vmem:[%s2442_s24 + $0x14] ss:$36 sps:$4 sm:$0xff]   ;;  %v2240_v19 = vld [vmem:[%s2442_s24 + $0x1c] ss:$36 sps:$4 sm:$0xff]   ;;  %v2245_v23 = vld [vmem:[%s2442_s24 + $0x64] ss:$36 sps:$4 sm:$0xff]  }
  0x23   : > { %1964 = vmatprep.subr.bf16.mxu1 %v2176_v29  ;;  %v2238_v18 = vld [vmem:[%s2442_s24 + $0x18] ss:$36 sps:$4 sm:$0xff]   ;;  %v2249_v26 = vld [vmem:[%s2644_s1 + $0x210] sm:$0xff]   ;;  %v2251_v27 = vld [vmem:[%s2442_s24 + $0xa4] ss:$36 sps:$4 sm:$0xff]  }
  0x24   : > { %v2243_v22 = vld [vmem:[%s2442_s24 + $0x5c] ss:$36 sps:$4 sm:$0xff]   ;;  %v2253_v28 = vld [vmem:[%s2442_s24 + $0xac] ss:$36 sps:$4 sm:$0xff]  }
  0x25   : > { %1925 = vmatpush3.bf16.msra.mxu0 %v2177_v30  ;;  %v2247_v24 = vld [vmem:[%s2442_s24 + $0x58] ss:$36 sps:$4 sm:$0xff]   ;;  %v2255_v30 = vld [vmem:[%s2442_s24 + $0xa0] ss:$36 sps:$4 sm:$0xff]   ;;  %v2259_v33 = vld [vmem:[%s2442_s24 + $0xec] ss:$36 sps:$4 sm:$0xff]  }
  0x26   : > { %1965 = vmatpush3.bf16.msra.mxu1 %v2178_v31  ;;  %1990 = vmatprep.subr.bf16.mxu0 %v2185_v36  ;;  %v2250_v29 = vld [vmem:[%s2644_s1 + $0x218] sm:$0xff]   ;;  %v2256_v31 = vld [vmem:[%s2442_s24 + $0xa8] ss:$36 sps:$4 sm:$0xff]  }
  0x27   : > { %2030 = vmatprep.subr.bf16.mxu1 %v2186_v37  ;;  %v2258_v35 = vld [vmem:[%s2644_s1 + $0x228] sm:$0xff]   ;;  %v2265_v37 = vld [vmem:[%s2644_s1 + $0x230] sm:$0xff]  }
  0x28   : > { %1212 = vmatmul.mubr.bf16.vlgmr.msra.gmra.mrb[0].mxu0 %v2179_v32  ;;  %v2257_v32 = vld [vmem:[%s2644_s1 + $0x220] sm:$0xff]   ;;  %v2263_v36 = vld [vmem:[%s2442_s24 + $0xe8] ss:$36 sps:$4 sm:$0xff]  }
  0x29   : > { %1277 = vmatmul.mubr.bf16.vlgmr.msra.gmra.mrb[0].mxu1 %v2182_v34  ;;  %1991 = vmatpush3.bf16.msra.mxu0 %v2187_v38  ;;  %v2261_v34 = vld [vmem:[%s2442_s24 + $0xf4] ss:$36 sps:$4 sm:$0xff]  }
  0x2a   : > { %2031 = vmatpush3.bf16.msra.mxu1 %v2188_v39  ;;  %1992 = vmatprep.subr.bf16.mxu0 %v2189_v40  ;;  %v2264_v38 = vld [vmem:[%s2442_s24 + $0xf0] ss:$36 sps:$4 sm:$0xff]   ;;  %v2267_v39 = vld [vmem:[%s2442_s24 + $0x20] ss:$36 sps:$4 sm:$0xff]  }
  0x2b   : > { %2032 = vmatprep.subr.bf16.mxu1 %v2190_v41  ;;  %1219 = vmatprep.mubr.bf16.mxu0 %v2193_v44  ;;  %v2268_v40 = vld [vmem:[%s2442_s24 + $0xb0] ss:$36 sps:$4 sm:$0xff]   ;;  %v2266_v41 = vld [vmem:[%s2644_s1 + $0x238] sm:$0xff]  }
  0x2c   : > { %1284 = vmatprep.mubr.bf16.mxu1 %v2195_v45 }
  0x2d   : > { %1993 = vmatpush3.bf16.msra.mxu0 %v2191_v42  ;;  %v2269_v42 = vld [vmem:[%s2442_s24 + $0x68] ss:$36 sps:$4 sm:$0xff]  }
  0x2e   : > { %2033 = vmatpush3.bf16.msra.mxu1 %v2192_v43  ;;  %1994 = vmatprep.subr.bf16.mxu0 %v2199_v48  ;;  %v2270_v43 = vld [vmem:[%s2442_s24 + $0xf8] ss:$36 sps:$4 sm:$0xff]   ;;  %s1796_s24 = sshll.u32 %s2654_s6, 3  ;;  %s1797_s6 = sshll.u32 %s2656_s18, 3 }
  0x2f   : > { %2034 = vmatprep.subr.bf16.mxu1 %v2200_v49  ;;  %s2615_s13 = scalar_lea.vmem %s2646_s3, %s1796_s24  ;;  %s350_s16 = scalar_lea.vmem %s2647_s4, %s1797_s6 }
  0x30   : > { %1220 = vmatmul.mubr.bf16.gmra.mrb[4].mxu0 %v2197_v46  ;;  %s357_s23 = scalar_lea.vmem %s2648_s5, %s1797_s6 }
  0x31   : > { %1285 = vmatmul.mubr.bf16.gmra.mrb[4].mxu1 %v2198_v47  ;;  %1995 = vmatpush3.bf16.msra.mxu0 %v2201_v50 }
  0x32   : > { %2035 = vmatpush3.bf16.msra.mxu1 %v2202_v51  ;;  %1996 = vmatprep.subr.bf16.mxu0 %v2203_v52 }
  0x33   : > { %2036 = vmatprep.subr.bf16.mxu1 %v2204_v53  ;;  %1227 = vmatprep.mubr.bf16.mxu0 %v2207_v56 }
  0x34   : > { %1292 = vmatprep.mubr.bf16.mxu1 %v2209_v57 }
  0x35   : > { %1997 = vmatpush3.bf16.msra.mxu0 %v2205_v54 }
  0x36   : > { %2037 = vmatpush3.bf16.msra.mxu1 %v2206_v55  ;;  %1998 = vmatprep.subr.bf16.mxu0 %v2213_v60 }
  0x37   : > { %2038 = vmatprep.subr.bf16.mxu1 %v2214_v61 }
  0x38   : > { %1228 = vmatmul.mubr.bf16.gmra.mrb[8].mxu0 %v2211_v58 }
  0x39   : > { %1293 = vmatmul.mubr.bf16.gmra.mrb[8].mxu1 %v2212_v59  ;;  %1999 = vmatpush3.bf16.msra.mxu0 %v2215_v62 }
  0x3a   : > { %2039 = vmatpush3.bf16.msra.mxu1 %v2216_v63  ;;  %2000 = vmatprep.subr.bf16.mxu0 %v2217_v0 }
  0x3b   : > { %2040 = vmatprep.subr.bf16.mxu1 %v2218_v1  ;;  %1235 = vmatprep.mubr.bf16.mxu0 %v2221_v4 }
  0x3c   : > { %1300 = vmatprep.mubr.bf16.mxu1 %v2223_v5 }
  0x3d   : > { %2001 = vmatpush3.bf16.msra.mxu0 %v2219_v2 }
  0x3e   : > { %2041 = vmatpush3.bf16.msra.mxu1 %v2220_v3  ;;  %2002 = vmatprep.subr.bf16.mxu0 %v2227_v8 }
  0x3f   : > { %2042 = vmatprep.subr.bf16.mxu1 %v2228_v9 }
  0x40   : > { %1236 = vmatmul.mubr.bf16.gmra.mrb[12].mxu0 %v2225_v6 }
  0x41   : > { %1301 = vmatmul.mubr.bf16.gmra.mrb[12].mxu1 %v2226_v7  ;;  %2003 = vmatpush3.bf16.msra.mxu0 %v2229_v10 }
  0x42   : > { %2043 = vmatpush3.bf16.msra.mxu1 %v2230_v11  ;;  %2004 = vmatprep.subr.bf16.mxu0 %v2231_v12 }
  0x43   : > { %2044 = vmatprep.subr.bf16.mxu1 %v2232_v13  ;;  %1341 = vmatprep.mubr.bf16.mxu0 %v2237_v17 }
  0x44   : > { %1406 = vmatprep.mubr.bf16.mxu1 %v2240_v19 }
  0x45   : > { %2005 = vmatpush3.bf16.msra.mxu0 %v2233_v14 }
  0x46   : > { %2045 = vmatpush3.bf16.msra.mxu1 %v2234_v15  ;;  %2082 = vmatprep.subr.bf16.mxu0 %v2241_v20 }
  0x47   : > { %2106 = vmatprep.subr.bf16.mxu1 %v2241_v20 }
  0x48   : > { %1342 = vmatmul.mubr.bf16.vlgmr.msra.gmra.mrb[16].mxu0 %v2235_v16 }
  0x49   : > { %1407 = vmatmul.mubr.bf16.vlgmr.msra.gmra.mrb[16].mxu1 %v2238_v18  ;;  %2083 = vmatpush3.bf16.msra.mxu0 %v2241_v20 }
  0x4a   : > { %2114 = vmatpush3.bf16.msra.mxu1 %v2241_v20  ;;  %2084 = vmatprep.subr.bf16.mxu0 %v2242_v21 }
  0x4b   : > { %2107 = vmatprep.subr.bf16.mxu1 %v2242_v21  ;;  %1349 = vmatprep.mubr.bf16.mxu0 %v2243_v22 }
  0x4c   : > { %1414 = vmatprep.mubr.bf16.mxu1 %v2245_v23 }
  0x4d   : > { %2085 = vmatpush3.bf16.msra.mxu0 %v2242_v21 }
  0x4e   : > { %2115 = vmatpush3.bf16.msra.mxu1 %v2242_v21  ;;  %2086 = vmatprep.subr.bf16.mxu0 %v2249_v26 }
  0x4f   : > { %2108 = vmatprep.subr.bf16.mxu1 %v2249_v26 }
  0x50   : > { %1350 = vmatmul.mubr.bf16.gmra.mrb[20].mxu0 %v2247_v24 }
  0x51   : > { %1415 = vmatmul.mubr.bf16.gmra.mrb[20].mxu1 %v2248_v25  ;;  %1357 = vmatprep.mubr.bf16.mxu0 %v2251_v27 }
  0x52   : > { %2087 = vmatpush3.bf16.msra.mxu0 %v2249_v26  ;;  %1422 = vmatprep.mubr.bf16.mxu1 %v2253_v28 }
  0x53   : > { %2116 = vmatpush3.bf16.msra.mxu1 %v2249_v26  ;;  %2088 = vmatprep.subr.bf16.mxu0 %v2250_v29 }
  0x54   : > { %2109 = vmatprep.subr.bf16.mxu1 %v2250_v29 }
  0x56   : > { %2089 = vmatpush3.bf16.msra.mxu0 %v2250_v29 }
  0x57   : > { %2117 = vmatpush3.bf16.msra.mxu1 %v2250_v29  ;;  %2090 = vmatprep.subr.bf16.mxu0 %v2257_v32 }
  0x58   : > { %1358 = vmatmul.mubr.bf16.gmra.mrb[24].mxu0 %v2255_v30  ;;  %2110 = vmatprep.subr.bf16.mxu1 %v2257_v32 }
  0x59   : > { %1423 = vmatmul.mubr.bf16.gmra.mrb[24].mxu1 %v2256_v31  ;;  %1365 = vmatprep.mubr.bf16.mxu0 %v2259_v33 }
  0x5a   : > { %2091 = vmatpush3.bf16.msra.mxu0 %v2257_v32  ;;  %1430 = vmatprep.mubr.bf16.mxu1 %v2261_v34 }
  0x5b   : > { %2118 = vmatpush3.bf16.msra.mxu1 %v2257_v32  ;;  %2092 = vmatprep.subr.bf16.mxu0 %v2258_v35 }
  0x5c   : > { %2111 = vmatprep.subr.bf16.mxu1 %v2258_v35 }
  0x5e   : > { %2093 = vmatpush3.bf16.msra.mxu0 %v2258_v35 }
  0x5f   : > { %2119 = vmatpush3.bf16.msra.mxu1 %v2258_v35  ;;  %2094 = vmatprep.subr.bf16.mxu0 %v2265_v37 }
  0x60   : > { %1366 = vmatmul.mubr.bf16.gmra.mrb[28].mxu0 %v2263_v36  ;;  %2112 = vmatprep.subr.bf16.mxu1 %v2265_v37 }
  0x61   : > { %1431 = vmatmul.mubr.bf16.gmra.mrb[28].mxu1 %v2264_v38  ;;  %2098 = vmatprep.mubr.bf16.mxu0 %v2267_v39 }
  0x62   : > { %2095 = vmatpush3.bf16.msra.mxu0 %v2265_v37  ;;  %2102 = vmatprep.mubr.bf16.mxu1 %v2268_v40 }
  0x63   : > { %2120 = vmatpush3.bf16.msra.mxu1 %v2265_v37  ;;  %2096 = vmatprep.subr.bf16.mxu0 %v2266_v41 }
  0x64   : > { %2113 = vmatprep.subr.bf16.mxu1 %v2266_v41 }
  0x66   : > { %2097 = vmatpush3.bf16.msra.mxu0 %v2266_v41 }
  0x67   : > { %2121 = vmatpush3.bf16.msra.mxu1 %v2266_v41 }
  0x69   : > { %2099 = vmatmul.mubr.bf16.vlgmr.msra.gmra.mrb[32].mxu0 %v2269_v42 }
  0x6a   : > { %2103 = vmatmul.mubr.bf16.vlgmr.msra.gmra.mrb[32].mxu1 %v2270_v43 }
  0xfb   : > { %v1926_v44 = vpop.f32.mrb[0].mxu0 }
  0xfc   : > { %v1966_v45 = vpop.f32.mrb[0].mxu1  ;;  %v1927_v46 = vpop.f32.mrb[1].mxu0 }
  0xfd   : > { %v1928_v47 = vadd.f32 %v1927_v46, %v1926_v44  ;;  %v1967_v48 = vpop.f32.mrb[1].mxu1  ;;  %v1929_v49 = vpop.f32.mrb[2].mxu0 }
  0xfe   : > { %v1968_v50 = vadd.f32 %v1967_v48, %v1966_v45  ;;  %v1969_v51 = vpop.f32.mrb[2].mxu1  ;;  %v1930_v52 = vpop.f32.mrb[3].mxu0 }
  0xff   : > { %v1931_v53 = vadd.f32 %v1930_v52, %v1929_v49  ;;  %v1970_v54 = vpop.f32.mrb[3].mxu1 }
 0x100   : > { %v1279_v55 = vadd.f32 %v1968_v50, %v1928_v47  ;;  %v1971_v56 = vadd.f32 %v1970_v54, %v1969_v51 }
 0x102   : > { %v1282_v57 = vadd.f32 %v1971_v56, %v1931_v53 }
 0x103   : > { %v1932_v58 = vpop.f32.mrb[4].mxu0 }
 0x104   : > { %v1972_v59 = vpop.f32.mrb[4].mxu1  ;;  %v1933_v60 = vpop.f32.mrb[5].mxu0 }
 0x105   : > { %v1934_v61 = vadd.f32 %v1933_v60, %v1932_v58  ;;  %v1973_v62 = vpop.f32.mrb[5].mxu1  ;;  %v1935_v63 = vpop.f32.mrb[6].mxu0 }
 0x106   : > { %v1974_v0 = vadd.f32 %v1973_v62, %v1972_v59  ;;  %v1975_v1 = vpop.f32.mrb[6].mxu1  ;;  %v1936_v2 = vpop.f32.mrb[7].mxu0 }
 0x107   : > { %v1937_v3 = vadd.f32 %v1936_v2, %v1935_v63  ;;  %v1976_v4 = vpop.f32.mrb[7].mxu1 }
 0x108   : > { %v1287_v5 = vadd.f32 %v1974_v0, %v1934_v61  ;;  %v1977_v6 = vadd.f32 %v1976_v4, %v1975_v1 }
 0x10a   : > { %v1290_v7 = vadd.f32 %v1977_v6, %v1937_v3 }
 0x10b   : > { %v1938_v8 = vpop.f32.mrb[8].mxu0 }
 0x10c   : > { %v1978_v9 = vpop.f32.mrb[8].mxu1  ;;  %v1939_v10 = vpop.f32.mrb[9].mxu0 }
 0x10d   : > { %v1940_v11 = vadd.f32 %v1939_v10, %v1938_v8  ;;  %v1979_v12 = vpop.f32.mrb[9].mxu1  ;;  %v1941_v13 = vpop.f32.mrb[10].mxu0 }
 0x10e   : > { %v1980_v14 = vadd.f32 %v1979_v12, %v1978_v9  ;;  %v1981_v15 = vpop.f32.mrb[10].mxu1  ;;  %v1942_v16 = vpop.f32.mrb[11].mxu0 }
 0x10f   : > { %v1943_v17 = vadd.f32 %v1942_v16, %v1941_v13  ;;  %v1982_v18 = vpop.f32.mrb[11].mxu1 }
 0x110   : > { %v1295_v19 = vadd.f32 %v1980_v14, %v1940_v11  ;;  %v1983_v20 = vadd.f32 %v1982_v18, %v1981_v15 }
 0x112   : > { %v1298_v21 = vadd.f32 %v1983_v20, %v1943_v17 }
 0x113   : > { %v1944_v22 = vpop.f32.mrb[12].mxu0 }
 0x114   : > { %v1984_v23 = vpop.f32.mrb[12].mxu1  ;;  %v1945_v24 = vpop.f32.mrb[13].mxu0 }
 0x115   : > { %v1985_v25 = vpop.f32.mrb[13].mxu1  ;;  %v1946_v26 = vadd.f32 %v1945_v24, %v1944_v22  ;;  %v1947_v28 = vpop.f32.mrb[14].mxu0 }
 0x116   : > { %v1986_v27 = vadd.f32 %v1985_v25, %v1984_v23  ;;  %v1987_v29 = vpop.f32.mrb[14].mxu1  ;;  %v1948_v30 = vpop.f32.mrb[15].mxu0 }
 0x117   : > { %v1988_v31 = vpop.f32.mrb[15].mxu1  ;;  %v1949_v33 = vadd.f32 %v1948_v30, %v1947_v28 }
 0x118   : > { %v1303_v32 = vadd.f32 %v1986_v27, %v1946_v26  ;;  %v1989_v34 = vadd.f32 %v1988_v31, %v1987_v29 }
 0x11a   : > { %v1306_v35 = vadd.f32 %v1989_v34, %v1949_v33 }
 0x11b   : > { %v2006_v36 = vpop.f32.mrb[16].mxu0 }
 0x11c   : > { %v2007_v37 = vpop.f32.mrb[17].mxu0  ;;  %v2046_v40 = vpop.f32.mrb[16].mxu1 }
 0x11d   : > { %v2008_v38 = vadd.f32 %v2007_v37, %v2006_v36  ;;  %v2009_v39 = vpop.f32.mrb[18].mxu0  ;;  %v2047_v42 = vpop.f32.mrb[17].mxu1 }
 0x11e   : > { %v2010_v41 = vpop.f32.mrb[19].mxu0  ;;  %v2048_v45 = vadd.f32 %v2047_v42, %v2046_v40  ;;  %v2049_v46 = vpop.f32.mrb[18].mxu1 }
 0x11f   : > { %v1344_v43 = vadd.f32 %v2008_v38, %v1279_v55  ;;  %v2011_v44 = vadd.f32 %v2010_v41, %v2009_v39  ;;  %v2050_v47 = vpop.f32.mrb[19].mxu1  ;;  %v1907_v39 = vld [vmem:[%s2645_s2] ss:$0 sm:$0xff] }
 0x120   : > { %v2051_v49 = vadd.f32 %v2050_v47, %v2049_v46 }
 0x121   : > { %v1347_v48 = vadd.f32 %v2011_v44, %v1282_v57  ;;  %v1409_v50 = vadd.f32 %v2048_v45, %v1344_v43 }
 0x123   : > { %v2012_v51 = vpop.f32.mrb[20].mxu0  ;;  %v2606_v52 = vadd.f32 %v2051_v49, %v1347_v48 }
 0x124   : > { %v2013_v53 = vpop.f32.mrb[21].mxu0  ;;  %v2052_v58 = vpop.f32.mrb[20].mxu1 }
 0x125   : > { %v2014_v54 = vadd.f32 %v2013_v53, %v2012_v51  ;;  %v2015_v56 = vpop.f32.mrb[22].mxu0  ;;  %v2053_v60 = vpop.f32.mrb[21].mxu1 }
 0x126   : > { %v2016_v59 = vpop.f32.mrb[23].mxu0  ;;  %v2054_v63 = vadd.f32 %v2053_v60, %v2052_v58  ;;  %v2055_v55 = vpop.f32.mrb[22].mxu1 }
 0x127   : > { %v1352_v61 = vadd.f32 %v2014_v54, %v1287_v5  ;;  %v2017_v62 = vadd.f32 %v2016_v59, %v2015_v56  ;;  %v2056_v0 = vpop.f32.mrb[23].mxu1 }
 0x128   : > { %v2057_v2 = vadd.f32 %v2056_v0, %v2055_v55 }
 0x129   : > { %v1355_v1 = vadd.f32 %v2017_v62, %v1290_v7  ;;  %v1417_v3 = vadd.f32 %v2054_v63, %v1352_v61 }
 0x12b   : > { %v2018_v57 = vpop.f32.mrb[24].mxu0  ;;  %v1420_v4 = vadd.f32 %v2057_v2, %v1355_v1 }
 0x12c   : > { %v2019_v6 = vpop.f32.mrb[25].mxu0  ;;  %v2058_v10 = vpop.f32.mrb[24].mxu1 }
 0x12d   : > { %v2020_v8 = vadd.f32 %v2019_v6, %v2018_v57  ;;  %v2021_v9 = vpop.f32.mrb[26].mxu0  ;;  %v2059_v12 = vpop.f32.mrb[25].mxu1 }
 0x12e   : > { %v2022_v11 = vpop.f32.mrb[27].mxu0  ;;  %v2060_v15 = vadd.f32 %v2059_v12, %v2058_v10  ;;  %v2061_v16 = vpop.f32.mrb[26].mxu1 }
 0x12f   : > { %v1360_v13 = vadd.f32 %v2020_v8, %v1295_v19  ;;  %v2023_v14 = vadd.f32 %v2022_v11, %v2021_v9  ;;  %v2062_v5 = vpop.f32.mrb[27].mxu1 }
 0x130   : > { %v2063_v18 = vadd.f32 %v2062_v5, %v2061_v16 }
 0x131   : > { %v1363_v17 = vadd.f32 %v2023_v14, %v1298_v21  ;;  %v1425_v20 = vadd.f32 %v2060_v15, %v1360_v13 }
 0x133   : > { %v2024_v22 = vpop.f32.mrb[28].mxu0  ;;  %v1428_v7 = vadd.f32 %v2063_v18, %v1363_v17 }
 0x134   : > { %v2025_v23 = vpop.f32.mrb[29].mxu0  ;;  %v2064_v26 = vpop.f32.mrb[28].mxu1 }
 0x135   : > { %v2026_v24 = vadd.f32 %v2025_v23, %v2024_v22  ;;  %v2027_v25 = vpop.f32.mrb[30].mxu0  ;;  %v2065_v28 = vpop.f32.mrb[29].mxu1 }
 0x136   : > { %v2028_v27 = vpop.f32.mrb[31].mxu0  ;;  %v2066_v31 = vadd.f32 %v2065_v28, %v2064_v26  ;;  %v2067_v19 = vpop.f32.mrb[30].mxu1 }
 0x137   : > { %v1368_v29 = vadd.f32 %v2026_v24, %v1303_v32  ;;  %v2029_v30 = vadd.f32 %v2028_v27, %v2027_v25  ;;  %v2068_v33 = vpop.f32.mrb[31].mxu1 }
 0x138   : > { %v2069_v36 = vadd.f32 %v2068_v33, %v2067_v19 }
 0x139   : > { %v1371_v34 = vadd.f32 %v2029_v30, %v1306_v35  ;;  %v1433_v37 = vadd.f32 %v2066_v31, %v1368_v29 }
 0x13b   : > { %v1436_v21 = vadd.f32 %v2069_v36, %v1371_v34 }
 0x13c   : > { %v2100_v38 = vpop.f32.mrb[32].mxu0 }
 0x13d   : > { %v1482_v40 = vadd.f32 %v2100_v38, %v1417_v3  ;;  %v2104_v41 = vpop.f32.mrb[32].mxu1  ;;  %v1473_v42 = vpop.f32.mrb[33].mxu0 }
 0x13e   : > { %v1498_v32 = vadd.f32 %v2104_v41, %v1433_v37  ;;  %v1474_v35 = vadd.f32 %v1473_v42, %v1409_v50  ;;  %v1489_v43 = vpop.f32.mrb[33].mxu1  ;;  %v2101_v44 = vpop.f32.mrb[34].mxu0 }
 0x13f   : > { %v1540_v45 = vadd.f32 %v1907_v39, %v1482_v40  ;;  %v1490_v46 = vadd.f32 %v1489_v43, %v1425_v20  ;;  %v1485_v47 = vadd.f32 %v2101_v44, %v1420_v4  ;;  %v2105_v48 = vpop.f32.mrb[34].mxu1  ;;  %v1476_v49 = vpop.f32.mrb[35].mxu0 }
 0x140   : > { %v1544_v51 = vadd.f32 %v1907_v39, %v1498_v32  ;;  %v1538_v53 = vadd.f32 %v1907_v39, %v1474_v35  ;;  %v1501_v54 = vadd.f32 %v2105_v48, %v1436_v21  ;;  %v1477_v56 = vadd.f32 %v1476_v49, %v2606_v52  ;;  %v1492_v58 = vpop.f32.mrb[35].mxu1 }
 0x141   : > { %1548 = vst [vmem:[%s2615_s13 + $0x10] sm:$0xff] %v1540_v45  ;;  %v1542_v50 = vadd.f32 %v1907_v39, %v1490_v46  ;;  %v1541_v59 = vadd.f32 %v1907_v39, %v1485_v47  ;;  %v1493_v60 = vadd.f32 %v1492_v58, %v1428_v7  ;;  %v1569_v52 = vmul.f32 %v1540_v45, %v1540_v45 }
 0x142   : > { %1552 = vst [vmem:[%s2615_s13 + $0x30] sm:$0xff] %v1544_v51  ;;  %1546 = vst [vmem:[%s2615_s13] sm:$0xff] %v1538_v53  ;;  %v1545_v61 = vadd.f32 %v1907_v39, %v1501_v54  ;;  %v1539_v62 = vadd.f32 %v1907_v39, %v1477_v56  ;;  %v1567_v55 = vmul.f32 %v1538_v53, %v1538_v53 }
 0x143   : > { %1550 = vst [vmem:[%s2615_s13 + $0x20] sm:$0xff] %v1542_v50  ;;  %1549 = vst [vmem:[%s2615_s13 + $0x18] sm:$0xff] %v1541_v59  ;;  %v1543_v63 = vadd.f32 %v1907_v39, %v1493_v60  ;;  %v1570_v57 = vmul.f32 %v1541_v59, %v1541_v59  ;;  %v1571_v8 = vmul.f32 %v1542_v50, %v1542_v50 }
 0x144   : > { %1553 = vst [vmem:[%s2615_s13 + $0x38] sm:$0xff] %v1545_v61  ;;  %1547 = vst [vmem:[%s2615_s13 + $0x8] sm:$0xff] %v1539_v62  ;;  %v1554_v0 = vadd.f32 %v1539_v62, %v1538_v53  ;;  %v1568_v1 = vmul.f32 %v1539_v62, %v1539_v62  ;;  %v1573_v14 = vmul.f32 %v1544_v51, %v1544_v51 }
 0x145   : > { %1551 = vst [vmem:[%s2615_s13 + $0x28] sm:$0xff] %v1543_v63  ;;  %v1572_v12 = vmul.f32 %v1543_v63, %v1543_v63  ;;  %v1574_v5 = vmul.f32 %v1545_v61, %v1545_v61 }
 0x146   : > { %v1555_v2 = vadd.f32 %v1554_v0, %v1540_v45  ;;  %v1575_v3 = vadd.f32 %v1568_v1, %v1567_v55 }
 0x148   : > { %v1576_v4 = vadd.f32 %v1575_v3, %v1569_v52  ;;  %v1556_v6 = vadd.f32 %v1555_v2, %v1541_v59 }
 0x14a   : > { %v1557_v9 = vadd.f32 %v1556_v6, %v1542_v50  ;;  %v1577_v10 = vadd.f32 %v1576_v4, %v1570_v57 }
 0x14c   : > { %v1558_v11 = vadd.f32 %v1557_v9, %v1543_v63  ;;  %v1578_v13 = vadd.f32 %v1577_v10, %v1571_v8 }
 0x14e   : > { %v1559_v15 = vadd.f32 %v1558_v11, %v1544_v51  ;;  %v1579_v16 = vadd.f32 %v1578_v13, %v1572_v12 }
 0x150   : > { %v1560_v17 = vadd.f32 %v1559_v15, %v1545_v61  ;;  %v1580_v18 = vadd.f32 %v1579_v16, %v1573_v14 }
 0x152   : > { %v1561_v20 = vrot.slane %v1560_v17, 4  ;;  %v1581_v22 = vadd.f32 %v1580_v18, %v1574_v5 }
 0x154   : > { %v1562_v7 = vadd.f32 %v1561_v20, %v1560_v17  ;;  %v1582_v23 = vrot.slane %v1581_v22, 4 }
 0x156   : > { %v1563_v24 = vrot.slane %v1562_v7, 2  ;;  %v1583_v25 = vadd.f32 %v1582_v23, %v1581_v22 }
 0x158   : > { %v1564_v26 = vadd.f32 %v1563_v24, %v1562_v7  ;;  %v1584_v27 = vrot.slane %v1583_v25, 2 }
 0x15a   : > { %v1565_v28 = vrot.slane %v1564_v26, 1  ;;  %v1585_v29 = vadd.f32 %v1584_v27, %v1583_v25 }
 0x15c   : > { %v1566_v30 = vadd.f32 %v1565_v28, %v1564_v26  ;;  %v1586_v31 = vrot.slane %v1585_v29, 1 }
 0x15e   : > { %v1587_v19 = vadd.f32 %v1586_v31, %v1585_v29  ;;  %1588 = vst [vmem:[%s350_s16] sm:$0xff] %v1566_v30 }
 0x160   : > { %1589 = vst [vmem:[%s357_s23] sm:$0xff] %v1587_v19 }
 0x161 PF: > { %s16_s20 = sadd.s32 1, %s2293_s20   ;;  %s2649_s18 = smov %s2289_s19 }
 0x162   : > { %p13_p6 = scmp.ge.s32.totalorder %s16_s20, 5   ;;  %s2650_s19 = smov %s2652_s21 }
 0x164   :  { %15 = sbr.rel (!%p13_p6) target bundleno = 2 (0x2), region = 100 }

// kernel: resnet_layer_forward.13
= control target key start
LH: loop header
LB: loop body
LE: loop exit
PB: predicated region body
PF: predicated region fallthrough
CT: control target
= control target key end

     0   :  { %s570_s15 = smov 0   ;;  %s572_s16 = smov 0   ;;  %s627_s0 = inlined_call_operand.vmem [shape: f32[192,128], index: 0, kind: input, shape index: {}]   ;;  %s628_s1 = inlined_call_operand.vmem [shape: f32[1,128], index: 1, kind: input, shape index: {}]   ;;  %s629_s2 = inlined_call_operand.vmem [shape: f32[1,128], index: 2, kind: input, shape index: {}]   ;;  %s630_s3 = inlined_call_operand.vmem [shape: f32[192,128], index: 3, kind: input, shape index: {}]   ;;  %s631_s4 = inlined_call_operand.vmem [shape: f32[192,128], index: 4, kind: output, shape index: {}]  }
   0x1   :  { %s574_s17 = smov 0  }
   0x2 LB: > { %s26_s18 = sadd.s32 1, %s539_s16  ;;  %p486_p0 = scmp.ge.s32.totalorder %s543_s17, 1  ;;  %s543_s17 = sphi %s574_s17, %s14_s17   ;;  %s539_s16 = sphi %s572_s16, %s633_s16   ;;  %s535_s15 = sphi %s570_s15, %s632_s15  }
   0x3   : > { %p28_p1 = scmp.ge.s32.totalorder %s26_s18, 3  ;;  %p214_p2 = scmp.lt.s32.totalorder %s543_s17, 4 }
   0x5   : > { %s635_s18 = smov (%p28_p1, %s26_s18), 0  ;;  %p215_p3 = pnand %p486_p0, %p214_p2 }
   0x6   : > { %s487_s19 = sshll.u32 (!%p215_p3), %s535_s15, 3  ;;  %v493_v0 = vld [vmem:[%s628_s1] ss:$0 sm:$0xff] (!%p215_p3) }
   0x7   : > { %218 = sbr.rel (%p215_p3) target bundleno = 32 (0x20), region = 36  ;;  %p261_p4 = scmp.lt.s32.totalorder (!%p215_p3), %s487_s19, 23  ;;  %v494_v2 = vld [vmem:[%s629_s2] ss:$0 sm:$0xff] (!%p215_p3) }
   0xe   : > { %s637_s19 = smov (!%p261_p4, %s487_s19), 23 }
   0xf   : > { %s588_s20 = sshll.u32 %s637_s19, 3 }
  0x10   : > { %s267_s25 = scalar_lea.vmem %s627_s0, %s588_s20  ;;  %s601_s28 = scalar_lea.vmem %s630_s3, %s588_s20 }
  0x11   : > { %v293_v1 = vld [vmem:[%s267_s25] sm:$0xff]  ;;  %v294_v3 = vld [vmem:[%s267_s25 + $0x8] sm:$0xff]  ;;  %v295_v7 = vld [vmem:[%s267_s25 + $0x10] sm:$0xff]  ;;  %s291_s7 = scalar_lea.vmem %s631_s4, %s588_s20 }
  0x12   : > { %v308_v4 = vmul.f32 %v493_v0, %v293_v1  ;;  %v331_v5 = vld [vmem:[%s601_s28] sm:$0xff]  ;;  %v309_v6 = vmul.f32 %v493_v0, %v294_v3  ;;  %v332_v8 = vld [vmem:[%s601_s28 + $0x8] sm:$0xff]  ;;  %v310_v9 = vmul.f32 %v493_v0, %v295_v7  ;;  %v296_v10 = vld [vmem:[%s267_s25 + $0x18] sm:$0xff] }
  0x13   : > { %v297_v11 = vld [vmem:[%s267_s25 + $0x20] sm:$0xff]  ;;  %v333_v14 = vld [vmem:[%s601_s28 + $0x10] sm:$0xff]  ;;  %v311_v15 = vmul.f32 %v493_v0, %v296_v10  ;;  %v334_v16 = vld [vmem:[%s601_s28 + $0x18] sm:$0xff] }
  0x14   : > { %v323_v12 = vadd.f32 %v494_v2, %v308_v4  ;;  %v324_v13 = vadd.f32 %v494_v2, %v309_v6  ;;  %v312_v17 = vmul.f32 %v493_v0, %v297_v11  ;;  %v298_v18 = vld [vmem:[%s267_s25 + $0x28] sm:$0xff]  ;;  %v325_v19 = vadd.f32 %v494_v2, %v310_v9  ;;  %v335_v20 = vld [vmem:[%s601_s28 + $0x20] sm:$0xff]  ;;  %v299_v22 = vld [vmem:[%s267_s25 + $0x30] sm:$0xff] }
  0x15   : > { %v313_v21 = vmul.f32 %v493_v0, %v298_v18  ;;  %v300_v23 = vld [vmem:[%s267_s25 + $0x38] sm:$0xff]  ;;  %v326_v26 = vadd.f32 %v494_v2, %v311_v15  ;;  %v336_v28 = vld [vmem:[%s601_s28 + $0x28] sm:$0xff]  ;;  %v314_v31 = vmul.f32 %v493_v0, %v299_v22  ;;  %v337_v37 = vld [vmem:[%s601_s28 + $0x30] sm:$0xff] }
  0x16   : > { %v339_v24 = vadd.f32 %v331_v5, %v323_v12  ;;  %v340_v25 = vadd.f32 %v332_v8, %v324_v13  ;;  %v327_v27 = vadd.f32 %v494_v2, %v312_v17  ;;  %v341_v29 = vadd.f32 %v333_v14, %v325_v19  ;;  %v338_v38 = vld [vmem:[%s601_s28 + $0x38] sm:$0xff] }
  0x17   : > { %v328_v30 = vadd.f32 %v494_v2, %v313_v21  ;;  %v315_v32 = vmul.f32 %v493_v0, %v300_v23  ;;  %v342_v35 = vadd.f32 %v334_v16, %v326_v26  ;;  %v329_v41 = vadd.f32 %v494_v2, %v314_v31 }
  0x18   : > { %v347_v33 = vmax.f32 %v339_v24, 0.0  ;;  %v348_v34 = vmax.f32 %v340_v25, 0.0  ;;  %v343_v36 = vadd.f32 %v335_v20, %v327_v27  ;;  %v349_v39 = vmax.f32 %v341_v29, 0.0 }
  0x19   : > { %v344_v40 = vadd.f32 %v336_v28, %v328_v30  ;;  %v330_v42 = vadd.f32 %v494_v2, %v315_v32  ;;  %v350_v43 = vmax.f32 %v342_v35, 0.0  ;;  %v345_v46 = vadd.f32 %v337_v37, %v329_v41 }
  0x1a   : > { %355 = vst [vmem:[%s291_s7] sm:$0xff] %v347_v33  ;;  %356 = vst [vmem:[%s291_s7 + $0x8] sm:$0xff] %v348_v34  ;;  %v351_v44 = vmax.f32 %v343_v36, 0.0 }
  0x1b   : > { %357 = vst [vmem:[%s291_s7 + $0x10] sm:$0xff] %v349_v39  ;;  %v352_v45 = vmax.f32 %v344_v40, 0.0  ;;  %v346_v47 = vadd.f32 %v338_v38, %v330_v42  ;;  %358 = vst [vmem:[%s291_s7 + $0x18] sm:$0xff] %v350_v43  ;;  %v353_v48 = vmax.f32 %v345_v46, 0.0 }
  0x1c   : > { %359 = vst [vmem:[%s291_s7 + $0x20] sm:$0xff] %v351_v44 }
  0x1d   : > { %360 = vst [vmem:[%s291_s7 + $0x28] sm:$0xff] %v352_v45  ;;  %v354_v49 = vmax.f32 %v346_v47, 0.0  ;;  %361 = vst [vmem:[%s291_s7 + $0x30] sm:$0xff] %v353_v48 }
  0x1f   : > { %362 = vst [vmem:[%s291_s7 + $0x38] sm:$0xff] %v354_v49 }
  0x20 PF: > { %s14_s17 = sadd.s32 1, %s543_s17   ;;  %s632_s15 = smov %s539_s16 }
  0x21   : > { %p11_p5 = scmp.ge.s32.totalorder %s14_s17, 5   ;;  %s633_s16 = smov %s635_s18 }
  0x23   :  { %13 = sbr.rel (!%p11_p5) target bundleno = 2 (0x2), region = 75 }

// kernel: resnet_layer_forward.12
= control target key start
LH: loop header
LB: loop body
LE: loop exit
PB: predicated region body
PF: predicated region fallthrough
CT: control target
= control target key end

     0   :  { %11 = vsyncpa [#allocation4], 0  ;;  %s1309_s0 = inlined_call_operand.vmem [shape: bf16[192,128], index: 0, kind: input, shape index: {}]   ;;  %s1310_s1 = inlined_call_operand.vmem [shape: bf16[128,128], index: 1, kind: input, shape index: {}]   ;;  %s1311_s2 = inlined_call_operand.vmem [shape: f32[1,128], index: 2, kind: input, shape index: {}]   ;;  %s1312_s3 = inlined_call_operand.vmem [shape: f32[192,128], index: 3, kind: output, shape index: {0}]   ;;  %s1313_s4 = inlined_call_operand.hbm [shape: f32[24,128], index: 4, kind: output, shape index: {1}]   ;;  %s1314_s5 = inlined_call_operand.hbm [shape: f32[24,128], index: 5, kind: output, shape index: {2}]  }
   0x1   :  { %13 = vsyncpa [#allocation4 + $0x1], 0 }
   0x2   :  { %14 = vsyncpa [#allocation6], 0 }
   0x3   :  { %16 = vsyncpa [#allocation6 + $0x1], 0  ;;  %s1121_s18 = smov 0   ;;  %s1123_s19 = smov 0  }
   0x4   :  { %s1125_s20 = smov 0   ;;  %s1127_s21 = smov 0  }
   0x5   :  { %s1129_s22 = smov 0   ;;  %s1131_s23 = smov 0  }
   0x6 LB: > { %s821_s24 = sadd.s32 4294967295, %s1087_s23   ;;  %s822_s25 = sadd.s32 4294967294, %s1087_s23   ;;  %s1087_s23 = sphi %s1131_s23, %s22_s23   ;;  %s1083_s22 = sphi %s1129_s22, %s1321_s22   ;;  %s1079_s21 = sphi %s1127_s21, %s1320_s21   ;;  %s1075_s20 = sphi %s1125_s20, %s1319_s20   ;;  %s1071_s19 = sphi %s1123_s19, %s1318_s19   ;;  %s1067_s18 = sphi %s1121_s18, %s1317_s18  }
   0x7   : > { %s41_s26 = sadd.s32 1, %s1083_s22  ;;  %s160_s27 = sadd.s32 1, %s1075_s20 }
   0x8   : > { %p43_p0 = scmp.ge.s32.totalorder %s41_s26, 3  ;;  %p170_p1 = scmp.ne.s32.totalorder %s1075_s20, %s1071_s19 }
   0x9   : > { %p171_p2 = scmp.eq.s32.totalorder %s821_s24, 2  ;;  %p176_p3 = scmp.ne.s32.totalorder %s1071_s19, %s1067_s18 }
   0xa   : > { %s1323_s26 = smov (%p43_p0, %s41_s26), 0  ;;  %p177_p5 = scmp.eq.s32.totalorder %s822_s25, 2 }
   0xb   : > { %p1161_p4 = por %p171_p2, %p170_p1  ;;  %s155_s29 = ssub.s32 %s1083_s22, %s1323_s26 }
   0xc   : > { %p827_p6 = scmp.ge.s32.totalorder %s1087_s23, 1  ;;  %p158_p7 = scmp.eq.s32.totalorder %s155_s29, 0 }
   0xd   : > { %p1168_p8 = por %p177_p5, %p176_p3  ;;  %p253_p9 = scmp.lt.s32.totalorder %s1087_s23, 4 }
   0xe   : > { %s1174_s6 = scalar_select %p158_p7, %s1075_s20, %s160_s27  }
   0xf   : > { %p254_p10 = pnand %p827_p6, %p253_p9 }
  0x10   : > { %v965_v0 = vld [vmem:[%s1310_s1] sm:$0xff] (!%p254_p10)   ;;  %s830_s9 = sshll.u32 (!%p254_p10), %s1079_s21, 3  ;;  %v966_v1 = vld [vmem:[%s1310_s1 + $0x8] sm:$0xff] (!%p254_p10)   ;;  %v967_v2 = vld [vmem:[%s1310_s1 + $0x10] sm:$0xff] (!%p254_p10)   ;;  %s849_s29 = sshll.u32 (!%p254_p10), %s1079_s21, 7 }
  0x11   : > { %257 = sbr.rel (%p254_p10) target bundleno = 329 (0x149), region = 32  ;;  %p309_p11 = scmp.lt.s32.totalorder (!%p254_p10), %s830_s9, 23  ;;  %865 = vmatprep.subr.bf16.mxu0 (!%p254_p10), %v965_v0  ;;  %889 = vmatprep.subr.bf16.mxu1 (!%p254_p10), %v965_v0  ;;  %v968_v3 = vld [vmem:[%s1310_s1 + $0x18] sm:$0xff] (!%p254_p10)   ;;  %v969_v6 = vld [vmem:[%s1310_s1 + $0x20] sm:$0xff] (!%p254_p10)   ;;  %v970_v7 = vld [vmem:[%s1310_s1 + $0x28] sm:$0xff] (!%p254_p10)  }
  0x12   : > { %866 = vmatpush3.bf16.msra.mxu0 (!%p254_p10), %v965_v0  ;;  %897 = vmatpush3.bf16.msra.mxu1 (!%p254_p10), %v965_v0  ;;  %v971_v8 = vld [vmem:[%s1310_s1 + $0x30] sm:$0xff] (!%p254_p10)   ;;  %v972_v9 = vld [vmem:[%s1310_s1 + $0x38] sm:$0xff] (!%p254_p10)   ;;  %v846_v12 = vld [vmem:[%s1311_s2] ss:$0 sm:$0xff] (!%p254_p10)  ;;  %s1238_s16 = scalar_lea.hbm (!%p254_p10), %s1314_s5, %s849_s29 }
  0x13   : > { %867 = vmatprep.subr.bf16.mxu0 (!%p254_p10), %v966_v1  ;;  %890 = vmatprep.subr.bf16.mxu1 (!%p254_p10), %v966_v1 }
  0x16   : > { %868 = vmatpush3.bf16.msra.mxu0 (!%p254_p10), %v966_v1  ;;  %898 = vmatpush3.bf16.msra.mxu1 (!%p254_p10), %v966_v1 }
  0x17   : > { %869 = vmatprep.subr.bf16.mxu0 (!%p254_p10), %v967_v2  ;;  %891 = vmatprep.subr.bf16.mxu1 (!%p254_p10), %v967_v2 }
  0x18   : > { %s1325_s9 = smov (!%p309_p11, %s830_s9), 23 }
  0x19   : > { %s831_s14 = sshll.u32 %s1325_s9, 2 }
  0x1a   : > { %s1192_s17 = scalar_lea.vmem %s1309_s0, %s831_s14  ;;  %870 = vmatpush3.bf16.msra.mxu0 %v967_v2  ;;  %899 = vmatpush3.bf16.msra.mxu1 %v967_v2  ;;  %s833_s14 = sshll.u32 %s1325_s9, 3 }
  0x1b   : > { %v973_v4 = vld [vmem:[%s1192_s17] sm:$0xff]   ;;  %v975_v5 = vld [vmem:[%s1192_s17 + $0x10] sm:$0xff]   ;;  %871 = vmatprep.subr.bf16.mxu0 %v968_v3  ;;  %892 = vmatprep.subr.bf16.mxu1 %v968_v3  ;;  %v974_v10 = vld [vmem:[%s1192_s17 + $0x8] sm:$0xff]   ;;  %s336_s27 = scalar_lea.vmem %s1312_s3, %s833_s14  ;;  %s1221_s9 = sand.u32 1, %s1071_s19  }
  0x1c   : > { %881 = vmatprep.mubr.bf16.mxu0 %v973_v4  ;;  %885 = vmatprep.mubr.bf16.mxu1 %v975_v5  ;;  %v976_v11 = vld [vmem:[%s1192_s17 + $0x18] sm:$0xff]   ;;  %s828_s17 = sshll.u32 %s1221_s9, 3  ;;  %s1231_s14 = scalar_lea.hbm %s1313_s4, %s849_s29 }
  0x1d   : > { %s300_s7 = scalar_lea.vmem [#allocation3], %s828_s17  ;;  %s1225_s10 = scalar_lea.vmem [#allocation5], %s828_s17 }
  0x1e   : > { %872 = vmatpush3.bf16.msra.mxu0 %v968_v3  ;;  %900 = vmatpush3.bf16.msra.mxu1 %v968_v3  ;;  %s638_s8 = sshll.u32 %s300_s7, 4  ;;  %s652_s11 = sshll.u32 %s1225_s10, 4  ;;  %s1233_s8 = int_to_ptr.vmem [resolvable:$true] %s638_s8  ;;  %s1240_s11 = int_to_ptr.vmem [resolvable:$true] %s652_s11 }
  0x1f   : > { %873 = vmatprep.subr.bf16.mxu0 %v969_v6  ;;  %893 = vmatprep.subr.bf16.mxu1 %v969_v6  ;;  %s615_s24 = scalar_lea.sflag [#allocation4], %s1221_s9  ;;  %s977_s25 = scalar_lea.vmem %s1233_s8, 128 }
  0x20   : > { %p978_p12 = scmp.ne.s32.totalorder %s1233_s8, %s977_s25 }
  0x22   : > { %874 = vmatpush3.bf16.msra.mxu0 %v969_v6  ;;  %901 = vmatpush3.bf16.msra.mxu1 %v969_v6  ;;  %p979_p13 = pnand %p978_p12, %p1161_p4 }
  0x23   : > { %875 = vmatprep.subr.bf16.mxu0 %v970_v7  ;;  %894 = vmatprep.subr.bf16.mxu1 %v970_v7 }
  0x24   : > { %p980_p0 = pneg %p979_p13 }
  0x26   : > { %876 = vmatpush3.bf16.msra.mxu0 %v970_v7  ;;  %902 = vmatpush3.bf16.msra.mxu1 %v970_v7 }
  0x27   : > { %877 = vmatprep.subr.bf16.mxu0 %v971_v8  ;;  %895 = vmatprep.subr.bf16.mxu1 %v971_v8 }
  0x2a   : > { %878 = vmatpush3.bf16.msra.mxu0 %v971_v8  ;;  %903 = vmatpush3.bf16.msra.mxu1 %v971_v8 }
  0x2b   : > { %879 = vmatprep.subr.bf16.mxu0 %v972_v9  ;;  %896 = vmatprep.subr.bf16.mxu1 %v972_v9 }
  0x2e   : > { %880 = vmatpush3.bf16.msra.mxu0 %v972_v9  ;;  %904 = vmatpush3.bf16.msra.mxu1 %v972_v9 }
  0x31   : > { %882 = vmatmul.mubr.bf16.vlgmr.msra.gmra.mrb[0].mxu0 %v974_v10  ;;  %886 = vmatmul.mubr.bf16.vlgmr.msra.gmra.mrb[0].mxu1 %v976_v11 }
 0x104   : > { %v883_v13 = vpop.f32.mrb[0].mxu0  ;;  %v887_v14 = vpop.f32.mrb[0].mxu1 }
 0x105   : > { %v556_v15 = vadd.f32 %v883_v13, %v846_v12  ;;  %v489_v16 = vpop.f32.mrb[1].mxu0  ;;  %v560_v17 = vadd.f32 %v887_v14, %v846_v12  ;;  %v505_v18 = vpop.f32.mrb[1].mxu1 }
 0x106   : > { %v554_v19 = vadd.f32 %v846_v12, %v489_v16  ;;  %v884_v20 = vpop.f32.mrb[2].mxu0  ;;  %v558_v21 = vadd.f32 %v846_v12, %v505_v18  ;;  %v888_v22 = vpop.f32.mrb[2].mxu1 }
 0x107   : > { %564 = vst [vmem:[%s336_s27 + $0x10] sm:$0xff] %v556_v15  ;;  %v557_v23 = vadd.f32 %v884_v20, %v846_v12  ;;  %v492_v24 = vpop.f32.mrb[3].mxu0  ;;  %568 = vst [vmem:[%s336_s27 + $0x30] sm:$0xff] %v560_v17  ;;  %v561_v25 = vadd.f32 %v888_v22, %v846_v12  ;;  %v508_v26 = vpop.f32.mrb[3].mxu1  ;;  %v585_v32 = vmul.f32 %v556_v15, %v556_v15 }
 0x108   : > { %562 = vst [vmem:[%s336_s27] sm:$0xff] %v554_v19  ;;  %v555_v27 = vadd.f32 %v846_v12, %v492_v24  ;;  %566 = vst [vmem:[%s336_s27 + $0x20] sm:$0xff] %v558_v21  ;;  %v559_v28 = vadd.f32 %v846_v12, %v508_v26  ;;  %v583_v29 = vmul.f32 %v554_v19, %v554_v19 }
 0x109   : > { %565 = vst [vmem:[%s336_s27 + $0x18] sm:$0xff] %v557_v23  ;;  %569 = vst [vmem:[%s336_s27 + $0x38] sm:$0xff] %v561_v25  ;;  %v586_v35 = vmul.f32 %v557_v23, %v557_v23  ;;  %v587_v38 = vmul.f32 %v558_v21, %v558_v21  ;;  %v589_v44 = vmul.f32 %v560_v17, %v560_v17 }
 0x10a   : > { %563 = vst [vmem:[%s336_s27 + $0x8] sm:$0xff] %v555_v27  ;;  %v570_v30 = vadd.f32 %v555_v27, %v554_v19  ;;  %v584_v31 = vmul.f32 %v555_v27, %v555_v27  ;;  %567 = vst [vmem:[%s336_s27 + $0x28] sm:$0xff] %v559_v28  ;;  %v588_v43 = vmul.f32 %v559_v28, %v559_v28  ;;  %s1089_s27 = smov [#allocation3]  }
 0x10b   : > { %v590_v47 = vmul.f32 %v561_v25, %v561_v25  ;;  %s981_s17 = sshll.u32 %s1089_s27, 4  ;;  %s982_s17 = int_to_ptr.vmem [resolvable:$false] %s981_s17 }
 0x10c   : > { %v571_v33 = vadd.f32 %v570_v30, %v556_v15  ;;  %v591_v34 = vadd.f32 %v584_v31, %v583_v29  ;;  %s983_s12 = scalar_lea.vmem %s982_s17, 256  ;;  %p984_p1 = scmp.lt.s32.totalorder %s1233_s8, %s982_s17 }
 0x10d   : > { %p985_p2 = scmp.lt.s32.totalorder %s983_s12, %s977_s25 }
 0x10e   : > { %v592_v36 = vadd.f32 %v591_v34, %v585_v32  ;;  %v572_v37 = vadd.f32 %v571_v33, %v557_v23 }
 0x10f   : > { %p986_p3 = por %p985_p2, %p984_p1 }
 0x110   : > { %v573_v39 = vadd.f32 %v572_v37, %v558_v21  ;;  %v593_v40 = vadd.f32 %v592_v36, %v586_v35 }
 0x111   : > { %p987_p5 = pnand %p986_p3, %p980_p0 }
 0x112   : > { %v594_v41 = vadd.f32 %v593_v40, %v587_v38  ;;  %v574_v42 = vadd.f32 %v573_v39, %v559_v28 }
 0x114   : > { %v575_v45 = vadd.f32 %v574_v42, %v560_v17  ;;  %v595_v46 = vadd.f32 %v594_v41, %v588_v43 }
 0x116   : > { %v576_v48 = vadd.f32 %v575_v45, %v561_v25  ;;  %v596_v49 = vadd.f32 %v595_v46, %v589_v44 }
 0x118   : > { %v577_v50 = vrot.slane %v576_v48, 4  ;;  %v597_v51 = vadd.f32 %v596_v49, %v590_v47 }
 0x11a   : > { %v578_v52 = vadd.f32 %v577_v50, %v576_v48  ;;  %v598_v53 = vrot.slane %v597_v51, 4 }
 0x11c   : > { %v579_v54 = vrot.slane %v578_v52, 2  ;;  %v599_v55 = vadd.f32 %v598_v53, %v597_v51 }
 0x11e   : > { %v580_v56 = vadd.f32 %v579_v54, %v578_v52  ;;  %v600_v57 = vrot.slane %v599_v55, 2 }
 0x120   : > { %v581_v58 = vrot.slane %v580_v56, 1  ;;  %v601_v59 = vadd.f32 %v600_v57, %v599_v55 }
 0x122   : > { %v582_v60 = vadd.f32 %v581_v58, %v580_v56  ;;  %v602_v61 = vrot.slane %v601_v59, 1 }
 0x124   : > { %604 = vst [vmem:[%s300_s7] sm:$0xff] %v582_v60  ;;  %v603_v62 = vadd.f32 %v602_v61, %v601_v59 }
 0x125   : > { %990 = shalt.err (!%p987_p5)
}
 0x126   : > { %s991_s29 = scalar_lea.hbm %s1231_s14, 128  ;;  %s995_s21 = scalar_lea.hbm %s1313_s4, 384 }
 0x127   : > { %p992_p6 = scmp.ne.s32.totalorder %s1231_s14, %s991_s29  ;;  %p996_p10 = scmp.lt.u32.totalorder %s1231_s14, %s1313_s4 }
 0x128   : > { %p997_p11 = scmp.lt.u32.totalorder %s995_s21, %s991_s29  ;;  %p999_p13 = scmp.lt.u32.totalorder %s991_s29, %s1231_s14 }
 0x129   : > { %p993_p7 = pnand %p992_p6, %p1161_p4 }
 0x12a   : > { %p998_p12 = por %p997_p11, %p996_p10 }
 0x12b   : > { %p994_p9 = pneg %p993_p7 }
 0x12c   : > { %p1000_p0 = por %p999_p13, %p998_p12 }
 0x12e   : > { %p1001_p1 = pnand %p1000_p0, %p994_p9 }
 0x130   : > { %1004 = shalt.err (!%p1001_p1)
}
 0x131   : > { %905 = dma.vmem_to_hbm [thread:$0]  (%p1161_p4), %s1233_s8, 128, %s1231_s14, %s615_s24   ;;  %605 = vst [vmem:[%s1225_s10] sm:$0xff] %v603_v62 }
 0x132   : > { %s620_s25 = scalar_lea.sflag [#allocation6], %s1221_s9  ;;  %s1005_s17 = scalar_lea.vmem %s1240_s11, 128 }
 0x133   : > { %p1006_p2 = scmp.ne.s32.totalorder %s1240_s11, %s1005_s17  ;;  %s1090_s12 = smov [#allocation5]  }
 0x134   : > { %s1009_s29 = sshll.u32 %s1090_s12, 4  ;;  %s1010_s29 = int_to_ptr.vmem [resolvable:$false] %s1009_s29 }
 0x135   : > { %p1007_p3 = pnand %p1006_p2, %p1161_p4  ;;  %s1011_s7 = scalar_lea.vmem %s1010_s29, 256 }
 0x136   : > { %p1012_p6 = scmp.lt.s32.totalorder %s1240_s11, %s1010_s29  ;;  %p1013_p7 = scmp.lt.s32.totalorder %s1011_s7, %s1005_s17 }
 0x137   : > { %p1008_p5 = pneg %p1007_p3 }
 0x138   : > { %p1014_p9 = por %p1013_p7, %p1012_p6 }
 0x13a   : > { %p1015_p10 = pnand %p1014_p9, %p1008_p5 }
 0x13c   : > { %1018 = shalt.err (!%p1015_p10)
}
 0x13d   : > { %s1019_s9 = scalar_lea.hbm %s1238_s16, 128  ;;  %s1023_s14 = scalar_lea.hbm %s1314_s5, 384 }
 0x13e   : > { %p1020_p11 = scmp.ne.s32.totalorder %s1238_s16, %s1019_s9  ;;  %p1024_p0 = scmp.lt.u32.totalorder %s1238_s16, %s1314_s5 }
 0x13f   : > { %p1025_p1 = scmp.lt.u32.totalorder %s1023_s14, %s1019_s9  ;;  %p1027_p3 = scmp.lt.u32.totalorder %s1019_s9, %s1238_s16 }
 0x140   : > { %p1021_p12 = pnand %p1020_p11, %p1161_p4 }
 0x141   : > { %p1026_p2 = por %p1025_p1, %p1024_p0 }
 0x142   : > { %p1022_p13 = pneg %p1021_p12 }
 0x143   : > { %p1028_p5 = por %p1027_p3, %p1026_p2 }
 0x145   : > { %p1029_p6 = pnand %p1028_p5, %p1022_p13 }
 0x147   : > { %1032 = shalt.err (!%p1029_p6)
}
 0x148   : > { %906 = dma.vmem_to_hbm [thread:$0]  (%p1161_p4), %s1240_s11, 128, %s1238_s16, %s620_s25  }
 0x149 PF: > { %p916_p7 = scmp.ge.s32.totalorder %s1087_s23, 2  ;;  %s675_s21 = sand.u32 1, %s1067_s18  }
 0x14a   : > { %s676_s15 = scalar_lea.sflag [#allocation4], %s675_s21 }
 0x14b   : > { %p910_p9 = pnand %p916_p7, %p1168_p8 }
 0x14d   : > { %1058 = dma.done.wait (!%p910_p9), %s676_s15, 128  }
 0x14e   : > { %1060 = vsyncadd (!%p910_p9), %s676_s15, 4294967168  ;;  %s685_s27 = scalar_lea.sflag [#allocation6], %s675_s21 }
 0x14f   : > { %1062 = dma.done.wait (!%p910_p9), %s685_s27, 128  }
 0x150   : > { %1064 = vsyncadd (!%p910_p9), %s685_s27, 4294967168  ;;  %s22_s23 = sadd.s32 1, %s1087_s23   ;;  %s1317_s18 = smov %s1071_s19 }
 0x151   : > { %p19_p10 = scmp.ge.s32.totalorder %s22_s23, 5   ;;  %s1318_s19 = smov %s1075_s20 }
 0x152   : > { %s1319_s20 = smov %s1174_s6  ;;  %s1320_s21 = smov %s1083_s22 }
 0x153   : > { %s1321_s22 = smov %s1323_s26  ;;  %21 = sbr.rel (!%p19_p10) target bundleno = 6 (0x6), region = 110 }
 0x15a   :  { %690 = vsyncpa [#allocation4], 1 }
 0x15b   :  { %692 = vsyncpa [#allocation4 + $0x1], 1 }
 0x15c   :  { %693 = vsyncpa [#allocation6], 1 }
 0x15d   :  { %695 = vsyncpa [#allocation6 + $0x1], 1 }

</bundles_post_ra>
